<compile_context>
chip_gen: v6e
topology: v6e:2x2x1
jax: 0.10.0
libtpu: 0.0.40
codegen_flags: <defaults>
</compile_context>

<pallas_src>
import numpy as np
import jax
import jax.numpy as jnp
from jax.experimental import pallas as pl
from jax.experimental.pallas import tpu as pltpu


# ----------------------------------------------------------------------------
# Kernel 1: RNNME = single-layer unidirectional LSTM (with length masking, i.e.
# pack_padded_sequence semantics) + LayerNorm + linear_2 on the sequence +
# linear_1 on the final hidden state.  Single invocation, static unroll over T.
# ----------------------------------------------------------------------------
def _rnnme_kernel(x_ref, len_ref, wih_ref, whh_ref, b_ref, ln_g_ref, ln_b_ref,
                  w2_ref, b2_ref, w1_ref, b1_ref,
                  seq_ref, emb_ref, hseq_ref):
    B, T, _ = x_ref.shape
    H = ln_g_ref.shape[-1]

    x = x_ref[...]                      # (B, T, Din)
    lens = len_ref[...]                 # (B, 1) int32
    wih = wih_ref[...]                  # (Din, 4H)
    whh = whh_ref[...]                  # (H, 4H)
    bias = b_ref[...]                   # (1, 4H)

    h = jnp.zeros((B, H), jnp.float32)
    c = jnp.zeros((B, H), jnp.float32)

    # Static unroll over T: one kernel invocation, no per-step grid overhead.
    # (Two small dots per step; at larger B/H one would fuse [wih;whh] into a
    #  single stacked weight to halve MXU pushes per step.)
    for t in range(T):
        x_t = x[:, t, :]                                                 # (B, Din)
        gates = (jnp.dot(x_t, wih, preferred_element_type=jnp.float32)
                 + jnp.dot(h, whh, preferred_element_type=jnp.float32)
                 + bias)                                                 # (B, 4H) i,f,g,o
        i_g = jax.nn.sigmoid(gates[:, 0:H])
        f_g = jax.nn.sigmoid(gates[:, H:2 * H])
        g_g = jnp.tanh(gates[:, 2 * H:3 * H])
        o_g = jax.nn.sigmoid(gates[:, 3 * H:4 * H])
        c_new = f_g * c + i_g * g_g
        h_new = o_g * jnp.tanh(c_new)
        mask = (t < lens).astype(jnp.float32)                            # (B, 1)
        c = mask * c_new + (1.0 - mask) * c
        h = mask * h_new + (1.0 - mask) * h                              # h at length-1 sticks
        hseq_ref[:, t, :] = mask * h_new                                 # padded steps -> 0

    # Head: LayerNorm over the full hidden sequence, then linear_2 per batch row
    # (one (T,H)@(H,O) matmul per sample instead of T tiny per-step matmuls).
    hs = hseq_ref[...]                                                   # (B, T, H)
    mu = jnp.mean(hs, axis=-1, keepdims=True)
    var = jnp.mean((hs - mu) ** 2, axis=-1, keepdims=True)
    xn = (hs - mu) * jax.lax.rsqrt(var + 1e-5) * ln_g_ref[...] + ln_b_ref[...]
    w2 = w2_ref[...]
    b2 = b2_ref[...]
    for b_i in range(B):
        seq_ref[b_i] = jnp.dot(xn[b_i], w2, preferred_element_type=jnp.float32) + b2

    # TODO(synk): nn.Dropout on h is identity in eval mode; train-mode dropout not implemented.
    emb_ref[...] = (jnp.dot(h, w1_ref[...], preferred_element_type=jnp.float32)
                    + b1_ref[...])


# ----------------------------------------------------------------------------
# Kernel 2: TextGNN dense message passing (src_mul_edge + max reduce), eta mix,
# per-graph masked mean pooling.  Vectorized (no per-destination loop); the
# Linear(768,768)+sigmoid is hoisted into the fused classifier kernel.
# One grid step per sample, "parallel" for megacore sharding.
# ----------------------------------------------------------------------------
def _gnn_kernel(h_ref, wT_ref, emT_ref, vm_ref, vm3_ref, invn_ref, eta_ref, out_ref):
    h = h_ref[0]                        # (N, K)      node features [node, k]
    wT = wT_ref[0]                      # (N, N, 1)   edge weights  [dst, src, 1]
    emT = emT_ref[0]                    # (N, N, 1)   edge mask     [dst, src, 1]
    vm = vm_ref[0]                      # (N, 1)      valid-node mask
    vm3 = vm3_ref[0]                    # (N, 1, 1)
    neg = jnp.float32(-1e30)

    # msgs[dst, src, k] = h[src, k] * w[src, dst] for existing edges, else -inf.
    msgs = jnp.where(emT > 0.0, h[None, :, :] * wT, neg)                 # (N, N, K)
    after = jnp.max(msgs, axis=1, keepdims=True)                         # (N, 1, K) max over src
    after = jnp.where(after > jnp.float32(-1e20), after, 0.0)            # zero-in-degree nodes -> 0

    eta = eta_ref[...]                                                   # (1, 1)
    # mean_nodes(eta*h + (1-eta)*after) over valid nodes (linearity in eta).
    sum_h = jnp.sum(h * vm, axis=0, keepdims=True)                       # (1, K)
    sum_after = jnp.sum(after * vm3, axis=0)                             # (1, K)
    pooled = (eta * sum_h + (1.0 - eta) * sum_after) * invn_ref[0]
    out_ref[0] = pooled


# ----------------------------------------------------------------------------
# Kernel 3 (fused): TextGNN embedding_layer1 + sigmoid on the pooled graph
# feature, FAFWNet feature-wise attention gate, LogisticModel classifier.
# The FAFW / classifier weights are pre-split by input segment (visual |
# acoustic | kb) so no feature concatenation is needed in-kernel.
# bf16 weights, f32 accumulation, f32 elementwise.
# ----------------------------------------------------------------------------
def _fusion_cls_kernel(vis_ref, ac_ref, kbp_ref, we_ref, be_ref,
                       w1v_ref, w1a_ref, w1k_ref, b1_ref, w2_ref, b2_ref,
                       wcv_ref, wca_ref, wck_ref, bc_ref, prob_ref):
    Ov = vis_ref.shape[-1]
    Oa = ac_ref.shape[-1]
    vis = vis_ref[...]
    ac = ac_ref[...]
    kbp = kbp_ref[...]

    # TextGNN.embedding_layer1 + Sigmoid (batched, hoisted out of the per-sample GNN grid).
    kb = jax.nn.sigmoid(jnp.dot(kbp.astype(jnp.bfloat16), we_ref[...],
                                preferred_element_type=jnp.float32) + be_ref[...])
    # TODO(synk): TextGNN dropout_layer and FAFW dropout are identity in eval mode.

    # TODO(synk): FAFWNet source not provided; implemented as the standard feature-wise
    # attention fusion block (Linear -> ReLU -> Linear -> Sigmoid -> elementwise scale).
    hid = jax.nn.relu(
        jnp.dot(vis.astype(jnp.bfloat16), w1v_ref[...], preferred_element_type=jnp.float32)
        + jnp.dot(ac.astype(jnp.bfloat16), w1a_ref[...], preferred_element_type=jnp.float32)
        + jnp.dot(kb.astype(jnp.bfloat16), w1k_ref[...], preferred_element_type=jnp.float32)
        + b1_ref[...])
    gate = jax.nn.sigmoid(jnp.dot(hid.astype(jnp.bfloat16), w2_ref[...],
                                  preferred_element_type=jnp.float32) + b2_ref[...])
    g_v = gate[:, 0:Ov]
    g_a = gate[:, Ov:Ov + Oa]
    g_k = gate[:, Ov + Oa:]

    # TODO(synk): LogisticModel source not provided; implemented as Linear -> Sigmoid.
    logits = (jnp.dot((vis * g_v).astype(jnp.bfloat16), wcv_ref[...],
                      preferred_element_type=jnp.float32)
              + jnp.dot((ac * g_a).astype(jnp.bfloat16), wca_ref[...],
                        preferred_element_type=jnp.float32)
              + jnp.dot((kb * g_k).astype(jnp.bfloat16), wck_ref[...],
                        preferred_element_type=jnp.float32)
              + bc_ref[...])
    prob_ref[...] = jax.nn.sigmoid(logits)


# ----------------------------------------------------------------------------
# Wrappers
# ----------------------------------------------------------------------------
def rnnme_forward(x, lengths, p):
    B, T, _ = x.shape
    H = p['ln_g'].shape[-1]
    O = p['w1'].shape[1]
    lens = lengths.astype(jnp.int32).reshape(B, 1)
    seq_o, emb = pl.pallas_call(
        _rnnme_kernel,
        out_shape=(jax.ShapeDtypeStruct((B, T, O), jnp.float32),
                   jax.ShapeDtypeStruct((B, O), jnp.float32)),
        scratch_shapes=[pltpu.VMEM((B, T, H), jnp.float32)],
    )(x.astype(jnp.float32), lens, p['wih'], p['whh'], p['b'],
      p['ln_g'], p['ln_b'], p['w2'], p['b2'], p['w1'], p['b1'])
    return {'sequence': seq_o, 'embedding': emb}


def textgnn_pool_forward(kb_graph, p):
    # Embedding gather stays on device (node_emb is a trainable parameter).
    node_h = jnp.take(p['node_emb'], kb_graph['node_ids'], axis=0)       # (B, N, K)
    B, N, K = node_h.shape
    pooled = pl.pallas_call(
        _gnn_kernel,
        out_shape=jax.ShapeDtypeStruct((B, 1, K), jnp.float32),
        grid_spec=pltpu.PrefetchScalarGridSpec(
            num_scalar_prefetch=0, grid=(B,),
            in_specs=[
                pl.BlockSpec((1, N, K), lambda b: (b, 0, 0)),
                pl.BlockSpec((1, N, N, 1), lambda b: (b, 0, 0, 0)),
                pl.BlockSpec((1, N, N, 1), lambda b: (b, 0, 0, 0)),
                pl.BlockSpec((1, N, 1), lambda b: (b, 0, 0)),
                pl.BlockSpec((1, N, 1, 1), lambda b: (b, 0, 0, 0)),
                pl.BlockSpec((1, 1, 1), lambda b: (b, 0, 0)),
                pl.BlockSpec((1, 1), lambda b: (0, 0)),
            ],
            out_specs=pl.BlockSpec((1, 1, K), lambda b: (b, 0, 0)),
        ),
        compiler_params=pltpu.CompilerParams(dimension_semantics=("parallel",)),
    )(node_h, kb_graph['wT'], kb_graph['emT'], kb_graph['v_mask'],
      kb_graph['v_mask3'], kb_graph['inv_n'], p['eta'])
    # TODO(synk): for large n_max the (N,N,K) message block would need K-tiling on v7x.
    return pooled[:, 0, :]                                               # (B, K)


def fusion_classifier_forward(vis_emb, ac_emb, kb_pooled, eke_p, cls_p):
    B = vis_emb.shape[0]
    C = cls_p['bc'].shape[-1]
    return pl.pallas_call(
        _fusion_cls_kernel,
        out_shape=jax.ShapeDtypeStruct((B, C), jnp.float32),
    )(vis_emb, ac_emb, kb_pooled,
      eke_p['we'], eke_p['be'],
      cls_p['w1_v'], cls_p['w1_a'], cls_p['w1_k'], cls_p['b1'],
      cls_p['w2'], cls_p['b2'],
      cls_p['wc_v'], cls_p['wc_a'], cls_p['wc_k'], cls_p['bc'])


def skeafn_forward(inputs, params):
    # TODO(synk): text channel (TextME pretrained BERT + TGINet cross-modal fusion) has no
    # in-script equivalent (pretrained weights / TGINet source unavailable); using
    # input_channels = {text:F, acoustic:T, visual:T, kb:T} -> fusion is
    # cat([visual_embedding, acoustic_embedding, kb_embedding], dim=1).
    acoustic = rnnme_forward(inputs['acoustic'], inputs['acoustic_length'],
                             params['me_acoustic'])
    visual = rnnme_forward(inputs['visual'], inputs['visual_length'],
                           params['me_visual'])
    kb_pooled = textgnn_pool_forward(inputs['kb_graph'], params['eke'])
    probs = fusion_classifier_forward(visual['embedding'], acoustic['embedding'],
                                      kb_pooled, params['eke'], params['fusion_cls'])
    return {'probs': probs}


# ----------------------------------------------------------------------------
# Host-side graph construction (mirrors create_graph_for_a_sample + dgl.batch).
# Hoisted out of the forward hot path; the PyTorch original also does this on
# the host via .cpu().numpy().
# ----------------------------------------------------------------------------
def prepare_kb_graph(token_ids, edge_matrix, edge_weights):
    tok = np.asarray(token_ids).astype(np.int64)
    B = tok.shape[0]
    uniques = [sorted(set(tok[b].tolist())) for b in range(B)]
    n_max = max(len(u) for u in uniques)
    node_ids = np.zeros((B, n_max), np.int32)
    wT = np.zeros((B, n_max, n_max, 1), np.float32)       # [b, dst, src, 1]
    emT = np.zeros((B, n_max, n_max, 1), np.float32)
    v_mask = np.zeros((B, n_max, 1), np.float32)
    inv_n = np.zeros((B, 1, 1), np.float32)
    for b in range(B):
        local = uniques[b]
        old2new = {old: i for i, old in enumerate(local)}
        n = len(local)
        node_ids[b, :n] = np.asarray(local, np.int32)
        v_mask[b, :n, 0] = 1.0
        inv_n[b, 0, 0] = 1.0 / n
        nz = [t for t in local if t != 0]
        if len(nz) == 0:
            nz = [0]
        for s_old in nz:                                   # all pairs of non-zero tokens
            for d_old in nz:
                s, d = old2new[s_old], old2new[d_old]
                eid = int(edge_matrix[s_old, d_old])
                wT[b, d, s, 0] = edge_weights[eid, 0]
                emT[b, d, s, 0] = 1.0
    return {
        'node_ids': jnp.asarray(node_ids),
        'wT': jnp.asarray(wT),
        'emT': jnp.asarray(emT),
        'v_mask': jnp.asarray(v_mask),
        'v_mask3': jnp.asarray(v_mask.reshape(B, n_max, 1, 1)),
        'inv_n': jnp.asarray(inv_n),
    }


# ----------------------------------------------------------------------------
# Deterministic parameter init (synthetic; shapes follow the module __init__).
# ----------------------------------------------------------------------------
def _uniform(key, shape, bound):
    return jax.random.uniform(key, shape, jnp.float32, -bound, bound)


def init_rnnme(key, din, hidden, out):
    ks = jax.random.split(key, 8)
    kb = 1.0 / np.sqrt(hidden)
    return {
        'wih': _uniform(ks[0], (din, 4 * hidden), kb),
        'whh': _uniform(ks[1], (hidden, 4 * hidden), kb),
        'b': _uniform(ks[2], (1, 4 * hidden), kb) + _uniform(ks[3], (1, 4 * hidden), kb),
        'ln_g': jnp.ones((1, hidden), jnp.float32),
        'ln_b': jnp.zeros((1, hidden), jnp.float32),
        'w1': _uniform(ks[4], (hidden, out), kb),
        'b1': _uniform(ks[5], (1, out), kb),
        'w2': _uniform(ks[6], (hidden, out), kb),
        'b2': _uniform(ks[7], (1, out), kb),
    }


def init_textgnn(key, vocab_size, k_dim, num_edges):
    ks = jax.random.split(key, 3)
    rng = np.random.RandomState(0)
    edge_matrix = rng.randint(0, num_edges, size=(vocab_size, vocab_size)).astype(np.int64)
    edge_weights = rng.uniform(0.1, 1.0, size=(num_edges, 1)).astype(np.float32)
    kb = 1.0 / np.sqrt(k_dim)
    return {
        'node_emb': jax.random.normal(ks[0], (vocab_size, k_dim), jnp.float32) * 0.02,
        'edge_matrix': edge_matrix,
        'edge_weights': edge_weights,
        'eta': jnp.zeros((1, 1), jnp.float32),             # node_eta.data.fill_(0)
        'we': _uniform(ks[1], (k_dim, k_dim), kb).astype(jnp.bfloat16),
        'be': _uniform(ks[2], (1, k_dim), kb),
    }


def init_fusion_cls(key, d_vis, d_ac, d_kb, c):
    d = d_vis + d_ac + d_kb
    ks = jax.random.split(key, 6)
    bnd = 1.0 / np.sqrt(d)
    w1 = _uniform(ks[0], (d, d), bnd)
    wc = _uniform(ks[4], (d, c), bnd)
    return {
        'w1_v': w1[:d_vis].astype(jnp.bfloat16),
        'w1_a': w1[d_vis:d_vis + d_ac].astype(jnp.bfloat16),
        'w1_k': w1[d_vis + d_ac:].astype(jnp.bfloat16),
        'b1': _uniform(ks[1], (1, d), bnd),
        'w2': _uniform(ks[2], (d, d), bnd).astype(jnp.bfloat16),
        'b2': _uniform(ks[3], (1, d), bnd),
        'wc_v': wc[:d_vis].astype(jnp.bfloat16),
        'wc_a': wc[d_vis:d_vis + d_ac].astype(jnp.bfloat16),
        'wc_k': wc[d_vis + d_ac:].astype(jnp.bfloat16),
        'bc': _uniform(ks[5], (1, c), bnd),
    }


if __name__ == "__main__":
    key = jax.random.PRNGKey(0)
    k_a, k_v, k_kb, k_f, kx1, kx2 = jax.random.split(key, 6)

    B = 2
    T_A, D_A, H_A = 8, 16, 32
    T_V, D_V, H_V = 8, 24, 32
    OUT = 64                              # RNNME output_size
    VOCAB, KDIM, NEDGES = 32, 768, 64     # TextGNN: embedding_layer1 is Linear(768, 768)
    NUM_CLASSES = 1

    params = {
        'me_acoustic': init_rnnme(k_a, D_A, H_A, OUT),
        'me_visual': init_rnnme(k_v, D_V, H_V, OUT),
        'eke': init_textgnn(k_kb, VOCAB, KDIM, NEDGES),
        'fusion_cls': init_fusion_cls(k_f, OUT, OUT, KDIM, NUM_CLASSES),
    }

    kb_tokens = jnp.array([[3, 7, 7, 0, 12, 5],
                           [0, 0, 0, 0, 0, 0]], jnp.int32)
    kb_graph = prepare_kb_graph(np.asarray(kb_tokens),
                                params['eke']['edge_matrix'],
                                params['eke']['edge_weights'])

    inputs = {
        'acoustic': jax.random.normal(kx1, (B, T_A, D_A), jnp.float32),
        'acoustic_mask': jnp.ones((B, T_A), jnp.float32),
        'acoustic_length': jnp.array([8, 5], jnp.int32),
        'visual': jax.random.normal(kx2, (B, T_V, D_V), jnp.float32),
        'visual_mask': jnp.ones((B, T_V), jnp.float32),
        'visual_length': jnp.array([6, 8], jnp.int32),
        'kb': kb_tokens,
        'kb_graph': kb_graph,
    }

    prob_dict = skeafn_forward(inputs, params)
    jax.block_until_ready(prob_dict['probs'])
    assert prob_dict['probs'].shape == (B, NUM_CLASSES)
    print("KERNEL_OK")
</pallas_src>

<mosaic_0001>
module attributes {stable_mosaic.version = 11 : i64} {
  func.func @_rnnme_kernel(%arg0: memref<2x8x16xf32, #tpu.memory_space<vmem>>, %arg1: memref<2x1xi32, #tpu.memory_space<vmem>>, %arg2: memref<16x128xf32, #tpu.memory_space<vmem>>, %arg3: memref<32x128xf32, #tpu.memory_space<vmem>>, %arg4: memref<1x128xf32, #tpu.memory_space<vmem>>, %arg5: memref<1x32xf32, #tpu.memory_space<vmem>>, %arg6: memref<1x32xf32, #tpu.memory_space<vmem>>, %arg7: memref<32x64xf32, #tpu.memory_space<vmem>>, %arg8: memref<1x64xf32, #tpu.memory_space<vmem>>, %arg9: memref<32x64xf32, #tpu.memory_space<vmem>>, %arg10: memref<1x64xf32, #tpu.memory_space<vmem>>, %arg11: memref<2x8x64xf32, #tpu.memory_space<vmem>>, %arg12: memref<2x64xf32, #tpu.memory_space<vmem>>, %arg13: memref<2x8x32xf32, #tpu.memory_space<vmem>>) attributes {dimension_semantics = [], scalar_prefetch = 0 : i64, scratch_operands = 1 : i64, tpu.core_type = #tpu.core_type<tc>} {
    %c0 = arith.constant 0 : index
    %c0_0 = arith.constant 0 : index
    %c0_1 = arith.constant 0 : index
    %0 = vector.load %arg0[%c0, %c0_0, %c0_1] : memref<2x8x16xf32, #tpu.memory_space<vmem>>, vector<2x8x16xf32>
    %c0_2 = arith.constant 0 : index
    %c0_3 = arith.constant 0 : index
    %1 = vector.load %arg1[%c0_2, %c0_3] : memref<2x1xi32, #tpu.memory_space<vmem>>, vector<2x1xi32>
    %c0_4 = arith.constant 0 : index
    %c0_5 = arith.constant 0 : index
    %2 = vector.load %arg2[%c0_4, %c0_5] : memref<16x128xf32, #tpu.memory_space<vmem>>, vector<16x128xf32>
    %c0_6 = arith.constant 0 : index
    %c0_7 = arith.constant 0 : index
    %3 = vector.load %arg3[%c0_6, %c0_7] : memref<32x128xf32, #tpu.memory_space<vmem>>, vector<32x128xf32>
    %c0_8 = arith.constant 0 : index
    %c0_9 = arith.constant 0 : index
    %4 = vector.load %arg4[%c0_8, %c0_9] : memref<1x128xf32, #tpu.memory_space<vmem>>, vector<1x128xf32>
    %cst = arith.constant 0.000000e+00 : f32
    %5 = vector.broadcast %cst : f32 to vector<2x32xf32>
    %cst_10 = arith.constant 0.000000e+00 : f32
    %6 = vector.broadcast %cst_10 : f32 to vector<2x32xf32>
    %7 = vector.extract_strided_slice %0 {offsets = [0, 0, 0], sizes = [2, 1, 16], strides = [1, 1, 1]} : vector<2x8x16xf32> to vector<2x1x16xf32>
    %8 = vector.shape_cast %7 : vector<2x1x16xf32> to vector<2x16xf32>
    %cst_11 = arith.constant dense<0.000000e+00> : vector<2x128xf32>
    %9 = tpu.matmul %8, %2, %cst_11 {dimension_numbers = #tpu.dot_dimension_numbers<[1], [0], [0], [1], [0, 0, 1, 1], [], []>} : vector<2x16xf32>, vector<16x128xf32>, vector<2x128xf32> -> vector<2x128xf32>
    %cst_12 = arith.constant dense<0.000000e+00> : vector<2x128xf32>
    %10 = tpu.matmul %5, %3, %cst_12 {dimension_numbers = #tpu.dot_dimension_numbers<[1], [0], [0], [1], [0, 0, 1, 1], [], []>} : vector<2x32xf32>, vector<32x128xf32>, vector<2x128xf32> -> vector<2x128xf32>
    %11 = arith.addf %9, %10 : vector<2x128xf32>
    %12 = vector.broadcast %4 : vector<1x128xf32> to vector<2x128xf32>
    %13 = arith.addf %11, %12 : vector<2x128xf32>
    %14 = vector.extract_strided_slice %13 {offsets = [0, 0], sizes = [2, 32], strides = [1, 1]} : vector<2x128xf32> to vector<2x32xf32>
    %15 = arith.negf %14 : vector<2x32xf32>
    %16 = math.exp %15 : vector<2x32xf32>
    %cst_13 = arith.constant 1.000000e+00 : f32
    %17 = vector.broadcast %cst_13 : f32 to vector<2x32xf32>
    %18 = arith.addf %17, %16 : vector<2x32xf32>
    %19 = arith.divf %17, %18 : vector<2x32xf32>
    %20 = vector.extract_strided_slice %13 {offsets = [0, 32], sizes = [2, 32], strides = [1, 1]} : vector<2x128xf32> to vector<2x32xf32>
    %21 = arith.negf %20 : vector<2x32xf32>
    %22 = math.exp %21 : vector<2x32xf32>
    %cst_14 = arith.constant 1.000000e+00 : f32
    %23 = vector.broadcast %cst_14 : f32 to vector<2x32xf32>
    %24 = arith.addf %23, %22 : vector<2x32xf32>
    %25 = arith.divf %23, %24 : vector<2x32xf32>
    %26 = vector.extract_strided_slice %13 {offsets = [0, 64], sizes = [2, 32], strides = [1, 1]} : vector<2x128xf32> to vector<2x32xf32>
    %27 = math.tanh %26 : vector<2x32xf32>
    %28 = vector.extract_strided_slice %13 {offsets = [0, 96], sizes = [2, 32], strides = [1, 1]} : vector<2x128xf32> to vector<2x32xf32>
    %29 = arith.negf %28 : vector<2x32xf32>
    %30 = math.exp %29 : vector<2x32xf32>
    %cst_15 = arith.constant 1.000000e+00 : f32
    %31 = vector.broadcast %cst_15 : f32 to vector<2x32xf32>
    %32 = arith.addf %31, %30 : vector<2x32xf32>
    %33 = arith.divf %31, %32 : vector<2x32xf32>
    %34 = arith.mulf %25, %6 : vector<2x32xf32>
    %35 = arith.mulf %19, %27 : vector<2x32xf32>
    %36 = arith.addf %34, %35 : vector<2x32xf32>
    %37 = math.tanh %36 : vector<2x32xf32>
    %38 = arith.mulf %33, %37 : vector<2x32xf32>
    %c0_i32 = arith.constant 0 : i32
    %39 = vector.broadcast %c0_i32 : i32 to vector<2x1xi32>
    %40 = arith.cmpi sgt, %1, %39 : vector<2x1xi32>
    %41 = arith.extui %40 : vector<2x1xi1> to vector<2x1xi32>
    %42 = arith.sitofp %41 : vector<2x1xi32> to vector<2x1xf32>
    %43 = vector.broadcast %42 : vector<2x1xf32> to vector<2x32xf32>
    %44 = arith.mulf %43, %36 : vector<2x32xf32>
    %cst_16 = arith.constant 1.000000e+00 : f32
    %45 = vector.broadcast %cst_16 : f32 to vector<2x1xf32>
    %46 = arith.subf %45, %42 : vector<2x1xf32>
    %47 = vector.broadcast %46 : vector<2x1xf32> to vector<2x32xf32>
    %48 = arith.mulf %47, %6 : vector<2x32xf32>
    %49 = arith.addf %44, %48 : vector<2x32xf32>
    %50 = vector.broadcast %42 : vector<2x1xf32> to vector<2x32xf32>
    %51 = arith.mulf %50, %38 : vector<2x32xf32>
    %cst_17 = arith.constant 1.000000e+00 : f32
    %52 = vector.broadcast %cst_17 : f32 to vector<2x1xf32>
    %53 = arith.subf %52, %42 : vector<2x1xf32>
    %54 = vector.broadcast %53 : vector<2x1xf32> to vector<2x32xf32>
    %55 = arith.mulf %54, %5 : vector<2x32xf32>
    %56 = arith.addf %51, %55 : vector<2x32xf32>
    %57 = vector.broadcast %42 : vector<2x1xf32> to vector<2x32xf32>
    %58 = arith.mulf %57, %38 : vector<2x32xf32>
    %c0_18 = arith.constant 0 : index
    %c0_19 = arith.constant 0 : index
    %c0_20 = arith.constant 0 : index
    %59 = vector.load %arg13[%c0_18, %c0_19, %c0_20] : memref<2x8x32xf32, #tpu.memory_space<vmem>>, vector<2x1x32xf32>
    %60 = vector.shape_cast %59 : vector<2x1x32xf32> to vector<2x32xf32>
    %61 = vector.shape_cast %58 : vector<2x32xf32> to vector<2x1x32xf32>
    tpu.vector_store %arg13[%c0_18, %c0_19, %c0_20], %61 {strides = array<i32>} : memref<2x8x32xf32, #tpu.memory_space<vmem>>, vector<2x1x32xf32>,
    %62 = vector.extract_strided_slice %0 {offsets = [0, 1, 0], sizes = [2, 1, 16], strides = [1, 1, 1]} : vector<2x8x16xf32> to vector<2x1x16xf32>
    %63 = vector.shape_cast %62 : vector<2x1x16xf32> to vector<2x16xf32>
    %cst_21 = arith.constant dense<0.000000e+00> : vector<2x128xf32>
    %64 = tpu.matmul %63, %2, %cst_21 {dimension_numbers = #tpu.dot_dimension_numbers<[1], [0], [0], [1], [0, 0, 1, 1], [], []>} : vector<2x16xf32>, vector<16x128xf32>, vector<2x128xf32> -> vector<2x128xf32>
    %cst_22 = arith.constant dense<0.000000e+00> : vector<2x128xf32>
    %65 = tpu.matmul %56, %3, %cst_22 {dimension_numbers = #tpu.dot_dimension_numbers<[1], [0], [0], [1], [0, 0, 1, 1], [], []>} : vector<2x32xf32>, vector<32x128xf32>, vector<2x128xf32> -> vector<2x128xf32>
    %66 = arith.addf %64, %65 : vector<2x128xf32>
    %67 = vector.broadcast %4 : vector<1x128xf32> to vector<2x128xf32>
    %68 = arith.addf %66, %67 : vector<2x128xf32>
    %69 = vector.extract_strided_slice %68 {offsets = [0, 0], sizes = [2, 32], strides = [1, 1]} : vector<2x128xf32> to vector<2x32xf32>
    %70 = arith.negf %69 : vector<2x32xf32>
    %71 = math.exp %70 : vector<2x32xf32>
    %cst_23 = arith.constant 1.000000e+00 : f32
    %72 = vector.broadcast %cst_23 : f32 to vector<2x32xf32>
    %73 = arith.addf %72, %71 : vector<2x32xf32>
    %74 = arith.divf %72, %73 : vector<2x32xf32>
    %75 = vector.extract_strided_slice %68 {offsets = [0, 32], sizes = [2, 32], strides = [1, 1]} : vector<2x128xf32> to vector<2x32xf32>
    %76 = arith.negf %75 : vector<2x32xf32>
    %77 = math.exp %76 : vector<2x32xf32>
    %cst_24 = arith.constant 1.000000e+00 : f32
    %78 = vector.broadcast %cst_24 : f32 to vector<2x32xf32>
    %79 = arith.addf %78, %77 : vector<2x32xf32>
    %80 = arith.divf %78, %79 : vector<2x32xf32>
    %81 = vector.extract_strided_slice %68 {offsets = [0, 64], sizes = [2, 32], strides = [1, 1]} : vector<2x128xf32> to vector<2x32xf32>
    %82 = math.tanh %81 : vector<2x32xf32>
    %83 = vector.extract_strided_slice %68 {offsets = [0, 96], sizes = [2, 32], strides = [1, 1]} : vector<2x128xf32> to vector<2x32xf32>
    %84 = arith.negf %83 : vector<2x32xf32>
    %85 = math.exp %84 : vector<2x32xf32>
    %cst_25 = arith.constant 1.000000e+00 : f32
    %86 = vector.broadcast %cst_25 : f32 to vector<2x32xf32>
    %87 = arith.addf %86, %85 : vector<2x32xf32>
    %88 = arith.divf %86, %87 : vector<2x32xf32>
    %89 = arith.mulf %80, %49 : vector<2x32xf32>
    %90 = arith.mulf %74, %82 : vector<2x32xf32>
    %91 = arith.addf %89, %90 : vector<2x32xf32>
    %92 = math.tanh %91 : vector<2x32xf32>
    %93 = arith.mulf %88, %92 : vector<2x32xf32>
    %c1_i32 = arith.constant 1 : i32
    %94 = vector.broadcast %c1_i32 : i32 to vector<2x1xi32>
    %95 = arith.cmpi sgt, %1, %94 : vector<2x1xi32>
    %96 = arith.extui %95 : vector<2x1xi1> to vector<2x1xi32>
    %97 = arith.sitofp %96 : vector<2x1xi32> to vector<2x1xf32>
    %98 = vector.broadcast %97 : vector<2x1xf32> to vector<2x32xf32>
    %99 = arith.mulf %98, %91 : vector<2x32xf32>
    %cst_26 = arith.constant 1.000000e+00 : f32
    %100 = vector.broadcast %cst_26 : f32 to vector<2x1xf32>
    %101 = arith.subf %100, %97 : vector<2x1xf32>
    %102 = vector.broadcast %101 : vector<2x1xf32> to vector<2x32xf32>
    %103 = arith.mulf %102, %49 : vector<2x32xf32>
    %104 = arith.addf %99, %103 : vector<2x32xf32>
    %105 = vector.broadcast %97 : vector<2x1xf32> to vector<2x32xf32>
    %106 = arith.mulf %105, %93 : vector<2x32xf32>
    %cst_27 = arith.constant 1.000000e+00 : f32
    %107 = vector.broadcast %cst_27 : f32 to vector<2x1xf32>
    %108 = arith.subf %107, %97 : vector<2x1xf32>
    %109 = vector.broadcast %108 : vector<2x1xf32> to vector<2x32xf32>
    %110 = arith.mulf %109, %56 : vector<2x32xf32>
    %111 = arith.addf %106, %110 : vector<2x32xf32>
    %112 = vector.broadcast %97 : vector<2x1xf32> to vector<2x32xf32>
    %113 = arith.mulf %112, %93 : vector<2x32xf32>
    %c0_28 = arith.constant 0 : index
    %c1 = arith.constant 1 : index
    %c0_29 = arith.constant 0 : index
    %114 = vector.load %arg13[%c0_28, %c1, %c0_29] : memref<2x8x32xf32, #tpu.memory_space<vmem>>, vector<2x1x32xf32>
    %115 = vector.shape_cast %114 : vector<2x1x32xf32> to vector<2x32xf32>
    %116 = vector.shape_cast %113 : vector<2x32xf32> to vector<2x1x32xf32>
    tpu.vector_store %arg13[%c0_28, %c1, %c0_29], %116 {strides = array<i32>} : memref<2x8x32xf32, #tpu.memory_space<vmem>>, vector<2x1x32xf32>,
    %117 = vector.extract_strided_slice %0 {offsets = [0, 2, 0], sizes = [2, 1, 16], strides = [1, 1, 1]} : vector<2x8x16xf32> to vector<2x1x16xf32>
    %118 = vector.shape_cast %117 : vector<2x1x16xf32> to vector<2x16xf32>
    %cst_30 = arith.constant dense<0.000000e+00> : vector<2x128xf32>
    %119 = tpu.matmul %118, %2, %cst_30 {dimension_numbers = #tpu.dot_dimension_numbers<[1], [0], [0], [1], [0, 0, 1, 1], [], []>} : vector<2x16xf32>, vector<16x128xf32>, vector<2x128xf32> -> vector<2x128xf32>
    %cst_31 = arith.constant dense<0.000000e+00> : vector<2x128xf32>
    %120 = tpu.matmul %111, %3, %cst_31 {dimension_numbers = #tpu.dot_dimension_numbers<[1], [0], [0], [1], [0, 0, 1, 1], [], []>} : vector<2x32xf32>, vector<32x128xf32>, vector<2x128xf32> -> vector<2x128xf32>
    %121 = arith.addf %119, %120 : vector<2x128xf32>
    %122 = vector.broadcast %4 : vector<1x128xf32> to vector<2x128xf32>
    %123 = arith.addf %121, %122 : vector<2x128xf32>
    %124 = vector.extract_strided_slice %123 {offsets = [0, 0], sizes = [2, 32], strides = [1, 1]} : vector<2x128xf32> to vector<2x32xf32>
    %125 = arith.negf %124 : vector<2x32xf32>
    %126 = math.exp %125 : vector<2x32xf32>
    %cst_32 = arith.constant 1.000000e+00 : f32
    %127 = vector.broadcast %cst_32 : f32 to vector<2x32xf32>
    %128 = arith.addf %127, %126 : vector<2x32xf32>
    %129 = arith.divf %127, %128 : vector<2x32xf32>
    %130 = vector.extract_strided_slice %123 {offsets = [0, 32], sizes = [2, 32], strides = [1, 1]} : vector<2x128xf32> to vector<2x32xf32>
    %131 = arith.negf %130 : vector<2x32xf32>
    %132 = math.exp %131 : vector<2x32xf32>
    %cst_33 = arith.constant 1.000000e+00 : f32
    %133 = vector.broadcast %cst_33 : f32 to vector<2x32xf32>
    %134 = arith.addf %133, %132 : vector<2x32xf32>
    %135 = arith.divf %133, %134 : vector<2x32xf32>
    %136 = vector.extract_strided_slice %123 {offsets = [0, 64], sizes = [2, 32], strides = [1, 1]} : vector<2x128xf32> to vector<2x32xf32>
    %137 = math.tanh %136 : vector<2x32xf32>
    %138 = vector.extract_strided_slice %123 {offsets = [0, 96], sizes = [2, 32], strides = [1, 1]} : vector<2x128xf32> to vector<2x32xf32>
    %139 = arith.negf %138 : vector<2x32xf32>
    %140 = math.exp %139 : vector<2x32xf32>
    %cst_34 = arith.constant 1.000000e+00 : f32
    %141 = vector.broadcast %cst_34 : f32 to vector<2x32xf32>
    %142 = arith.addf %141, %140 : vector<2x32xf32>
    %143 = arith.divf %141, %142 : vector<2x32xf32>
    %144 = arith.mulf %135, %104 : vector<2x32xf32>
    %145 = arith.mulf %129, %137 : vector<2x32xf32>
    %146 = arith.addf %144, %145 : vector<2x32xf32>
    %147 = math.tanh %146 : vector<2x32xf32>
    %148 = arith.mulf %143, %147 : vector<2x32xf32>
    %c2_i32 = arith.constant 2 : i32
    %149 = vector.broadcast %c2_i32 : i32 to vector<2x1xi32>
    %150 = arith.cmpi sgt, %1, %149 : vector<2x1xi32>
    %151 = arith.extui %150 : vector<2x1xi1> to vector<2x1xi32>
    %152 = arith.sitofp %151 : vector<2x1xi32> to vector<2x1xf32>
    %153 = vector.broadcast %152 : vector<2x1xf32> to vector<2x32xf32>
    %154 = arith.mulf %153, %146 : vector<2x32xf32>
    %cst_35 = arith.constant 1.000000e+00 : f32
    %155 = vector.broadcast %cst_35 : f32 to vector<2x1xf32>
    %156 = arith.subf %155, %152 : vector<2x1xf32>
    %157 = vector.broadcast %156 : vector<2x1xf32> to vector<2x32xf32>
    %158 = arith.mulf %157, %104 : vector<2x32xf32>
    %159 = arith.addf %154, %158 : vector<2x32xf32>
    %160 = vector.broadcast %152 : vector<2x1xf32> to vector<2x32xf32>
    %161 = arith.mulf %160, %148 : vector<2x32xf32>
    %cst_36 = arith.constant 1.000000e+00 : f32
    %162 = vector.broadcast %cst_36 : f32 to vector<2x1xf32>
    %163 = arith.subf %162, %152 : vector<2x1xf32>
    %164 = vector.broadcast %163 : vector<2x1xf32> to vector<2x32xf32>
    %165 = arith.mulf %164, %111 : vector<2x32xf32>
    %166 = arith.addf %161, %165 : vector<2x32xf32>
    %167 = vector.broadcast %152 : vector<2x1xf32> to vector<2x32xf32>
    %168 = arith.mulf %167, %148 : vector<2x32xf32>
    %c0_37 = arith.constant 0 : index
    %c2 = arith.constant 2 : index
    %c0_38 = arith.constant 0 : index
    %169 = vector.load %arg13[%c0_37, %c2, %c0_38] : memref<2x8x32xf32, #tpu.memory_space<vmem>>, vector<2x1x32xf32>
    %170 = vector.shape_cast %169 : vector<2x1x32xf32> to vector<2x32xf32>
    %171 = vector.shape_cast %168 : vector<2x32xf32> to vector<2x1x32xf32>
    tpu.vector_store %arg13[%c0_37, %c2, %c0_38], %171 {strides = array<i32>} : memref<2x8x32xf32, #tpu.memory_space<vmem>>, vector<2x1x32xf32>,
    %172 = vector.extract_strided_slice %0 {offsets = [0, 3, 0], sizes = [2, 1, 16], strides = [1, 1, 1]} : vector<2x8x16xf32> to vector<2x1x16xf32>
    %173 = vector.shape_cast %172 : vector<2x1x16xf32> to vector<2x16xf32>
    %cst_39 = arith.constant dense<0.000000e+00> : vector<2x128xf32>
    %174 = tpu.matmul %173, %2, %cst_39 {dimension_numbers = #tpu.dot_dimension_numbers<[1], [0], [0], [1], [0, 0, 1, 1], [], []>} : vector<2x16xf32>, vector<16x128xf32>, vector<2x128xf32> -> vector<2x128xf32>
    %cst_40 = arith.constant dense<0.000000e+00> : vector<2x128xf32>
    %175 = tpu.matmul %166, %3, %cst_40 {dimension_numbers = #tpu.dot_dimension_numbers<[1], [0], [0], [1], [0, 0, 1, 1], [], []>} : vector<2x32xf32>, vector<32x128xf32>, vector<2x128xf32> -> vector<2x128xf32>
    %176 = arith.addf %174, %175 : vector<2x128xf32>
    %177 = vector.broadcast %4 : vector<1x128xf32> to vector<2x128xf32>
    %178 = arith.addf %176, %177 : vector<2x128xf32>
    %179 = vector.extract_strided_slice %178 {offsets = [0, 0], sizes = [2, 32], strides = [1, 1]} : vector<2x128xf32> to vector<2x32xf32>
    %180 = arith.negf %179 : vector<2x32xf32>
    %181 = math.exp %180 : vector<2x32xf32>
    %cst_41 = arith.constant 1.000000e+00 : f32
    %182 = vector.broadcast %cst_41 : f32 to vector<2x32xf32>
    %183 = arith.addf %182, %181 : vector<2x32xf32>
    %184 = arith.divf %182, %183 : vector<2x32xf32>
    %185 = vector.extract_strided_slice %178 {offsets = [0, 32], sizes = [2, 32], strides = [1, 1]} : vector<2x128xf32> to vector<2x32xf32>
    %186 = arith.negf %185 : vector<2x32xf32>
    %187 = math.exp %186 : vector<2x32xf32>
    %cst_42 = arith.constant 1.000000e+00 : f32
    %188 = vector.broadcast %cst_42 : f32 to vector<2x32xf32>
    %189 = arith.addf %188, %187 : vector<2x32xf32>
    %190 = arith.divf %188, %189 : vector<2x32xf32>
    %191 = vector.extract_strided_slice %178 {offsets = [0, 64], sizes = [2, 32], strides = [1, 1]} : vector<2x128xf32> to vector<2x32xf32>
    %192 = math.tanh %191 : vector<2x32xf32>
    %193 = vector.extract_strided_slice %178 {offsets = [0, 96], sizes = [2, 32], strides = [1, 1]} : vector<2x128xf32> to vector<2x32xf32>
    %194 = arith.negf %193 : vector<2x32xf32>
    %195 = math.exp %194 : vector<2x32xf32>
    %cst_43 = arith.constant 1.000000e+00 : f32
    %196 = vector.broadcast %cst_43 : f32 to vector<2x32xf32>
    %197 = arith.addf %196, %195 : vector<2x32xf32>
    %198 = arith.divf %196, %197 : vector<2x32xf32>
    %199 = arith.mulf %190, %159 : vector<2x32xf32>
    %200 = arith.mulf %184, %192 : vector<2x32xf32>
    %201 = arith.addf %199, %200 : vector<2x32xf32>
    %202 = math.tanh %201 : vector<2x32xf32>
    %203 = arith.mulf %198, %202 : vector<2x32xf32>
    %c3_i32 = arith.constant 3 : i32
    %204 = vector.broadcast %c3_i32 : i32 to vector<2x1xi32>
    %205 = arith.cmpi sgt, %1, %204 : vector<2x1xi32>
    %206 = arith.extui %205 : vector<2x1xi1> to vector<2x1xi32>
    %207 = arith.sitofp %206 : vector<2x1xi32> to vector<2x1xf32>
    %208 = vector.broadcast %207 : vector<2x1xf32> to vector<2x32xf32>
    %209 = arith.mulf %208, %201 : vector<2x32xf32>
    %cst_44 = arith.constant 1.000000e+00 : f32
    %210 = vector.broadcast %cst_44 : f32 to vector<2x1xf32>
    %211 = arith.subf %210, %207 : vector<2x1xf32>
    %212 = vector.broadcast %211 : vector<2x1xf32> to vector<2x32xf32>
    %213 = arith.mulf %212, %159 : vector<2x32xf32>
    %214 = arith.addf %209, %213 : vector<2x32xf32>
    %215 = vector.broadcast %207 : vector<2x1xf32> to vector<2x32xf32>
    %216 = arith.mulf %215, %203 : vector<2x32xf32>
    %cst_45 = arith.constant 1.000000e+00 : f32
    %217 = vector.broadcast %cst_45 : f32 to vector<2x1xf32>
    %218 = arith.subf %217, %207 : vector<2x1xf32>
    %219 = vector.broadcast %218 : vector<2x1xf32> to vector<2x32xf32>
    %220 = arith.mulf %219, %166 : vector<2x32xf32>
    %221 = arith.addf %216, %220 : vector<2x32xf32>
    %222 = vector.broadcast %207 : vector<2x1xf32> to vector<2x32xf32>
    %223 = arith.mulf %222, %203 : vector<2x32xf32>
    %c0_46 = arith.constant 0 : index
    %c3 = arith.constant 3 : index
    %c0_47 = arith.constant 0 : index
    %224 = vector.load %arg13[%c0_46, %c3, %c0_47] : memref<2x8x32xf32, #tpu.memory_space<vmem>>, vector<2x1x32xf32>
    %225 = vector.shape_cast %224 : vector<2x1x32xf32> to vector<2x32xf32>
    %226 = vector.shape_cast %223 : vector<2x32xf32> to vector<2x1x32xf32>
    tpu.vector_store %arg13[%c0_46, %c3, %c0_47], %226 {strides = array<i32>} : memref<2x8x32xf32, #tpu.memory_space<vmem>>, vector<2x1x32xf32>,
    %227 = vector.extract_strided_slice %0 {offsets = [0, 4, 0], sizes = [2, 1, 16], strides = [1, 1, 1]} : vector<2x8x16xf32> to vector<2x1x16xf32>
    %228 = vector.shape_cast %227 : vector<2x1x16xf32> to vector<2x16xf32>
    %cst_48 = arith.constant dense<0.000000e+00> : vector<2x128xf32>
    %229 = tpu.matmul %228, %2, %cst_48 {dimension_numbers = #tpu.dot_dimension_numbers<[1], [0], [0], [1], [0, 0, 1, 1], [], []>} : vector<2x16xf32>, vector<16x128xf32>, vector<2x128xf32> -> vector<2x128xf32>
    %cst_49 = arith.constant dense<0.000000e+00> : vector<2x128xf32>
    %230 = tpu.matmul %221, %3, %cst_49 {dimension_numbers = #tpu.dot_dimension_numbers<[1], [0], [0], [1], [0, 0, 1, 1], [], []>} : vector<2x32xf32>, vector<32x128xf32>, vector<2x128xf32> -> vector<2x128xf32>
    %231 = arith.addf %229, %230 : vector<2x128xf32>
    %232 = vector.broadcast %4 : vector<1x128xf32> to vector<2x128xf32>
    %233 = arith.addf %231, %232 : vector<2x128xf32>
    %234 = vector.extract_strided_slice %233 {offsets = [0, 0], sizes = [2, 32], strides = [1, 1]} : vector<2x128xf32> to vector<2x32xf32>
    %235 = arith.negf %234 : vector<2x32xf32>
    %236 = math.exp %235 : vector<2x32xf32>
    %cst_50 = arith.constant 1.000000e+00 : f32
    %237 = vector.broadcast %cst_50 : f32 to vector<2x32xf32>
    %238 = arith.addf %237, %236 : vector<2x32xf32>
    %239 = arith.divf %237, %238 : vector<2x32xf32>
    %240 = vector.extract_strided_slice %233 {offsets = [0, 32], sizes = [2, 32], strides = [1, 1]} : vector<2x128xf32> to vector<2x32xf32>
    %241 = arith.negf %240 : vector<2x32xf32>
    %242 = math.exp %241 : vector<2x32xf32>
    %cst_51 = arith.constant 1.000000e+00 : f32
    %243 = vector.broadcast %cst_51 : f32 to vector<2x32xf32>
    %244 = arith.addf %243, %242 : vector<2x32xf32>
    %245 = arith.divf %243, %244 : vector<2x32xf32>
    %246 = vector.extract_strided_slice %233 {offsets = [0, 64], sizes = [2, 32], strides = [1, 1]} : vector<2x128xf32> to vector<2x32xf32>
    %247 = math.tanh %246 : vector<2x32xf32>
    %248 = vector.extract_strided_slice %233 {offsets = [0, 96], sizes = [2, 32], strides = [1, 1]} : vector<2x128xf32> to vector<2x32xf32>
    %249 = arith.negf %248 : vector<2x32xf32>
    %250 = math.exp %249 : vector<2x32xf32>
    %cst_52 = arith.constant 1.000000e+00 : f32
    %251 = vector.broadcast %cst_52 : f32 to vector<2x32xf32>
    %252 = arith.addf %251, %250 : vector<2x32xf32>
    %253 = arith.divf %251, %252 : vector<2x32xf32>
    %254 = arith.mulf %245, %214 : vector<2x32xf32>
    %255 = arith.mulf %239, %247 : vector<2x32xf32>
    %256 = arith.addf %254, %255 : vector<2x32xf32>
    %257 = math.tanh %256 : vector<2x32xf32>
    %258 = arith.mulf %253, %257 : vector<2x32xf32>
    %c4_i32 = arith.constant 4 : i32
    %259 = vector.broadcast %c4_i32 : i32 to vector<2x1xi32>
    %260 = arith.cmpi sgt, %1, %259 : vector<2x1xi32>
    %261 = arith.extui %260 : vector<2x1xi1> to vector<2x1xi32>
    %262 = arith.sitofp %261 : vector<2x1xi32> to vector<2x1xf32>
    %263 = vector.broadcast %262 : vector<2x1xf32> to vector<2x32xf32>
    %264 = arith.mulf %263, %256 : vector<2x32xf32>
    %cst_53 = arith.constant 1.000000e+00 : f32
    %265 = vector.broadcast %cst_53 : f32 to vector<2x1xf32>
    %266 = arith.subf %265, %262 : vector<2x1xf32>
    %267 = vector.broadcast %266 : vector<2x1xf32> to vector<2x32xf32>
    %268 = arith.mulf %267, %214 : vector<2x32xf32>
    %269 = arith.addf %264, %268 : vector<2x32xf32>
    %270 = vector.broadcast %262 : vector<2x1xf32> to vector<2x32xf32>
    %271 = arith.mulf %270, %258 : vector<2x32xf32>
    %cst_54 = arith.constant 1.000000e+00 : f32
    %272 = vector.broadcast %cst_54 : f32 to vector<2x1xf32>
    %273 = arith.subf %272, %262 : vector<2x1xf32>
    %274 = vector.broadcast %273 : vector<2x1xf32> to vector<2x32xf32>
    %275 = arith.mulf %274, %221 : vector<2x32xf32>
    %276 = arith.addf %271, %275 : vector<2x32xf32>
    %277 = vector.broadcast %262 : vector<2x1xf32> to vector<2x32xf32>
    %278 = arith.mulf %277, %258 : vector<2x32xf32>
    %c0_55 = arith.constant 0 : index
    %c4 = arith.constant 4 : index
    %c0_56 = arith.constant 0 : index
    %279 = vector.load %arg13[%c0_55, %c4, %c0_56] : memref<2x8x32xf32, #tpu.memory_space<vmem>>, vector<2x1x32xf32>
    %280 = vector.shape_cast %279 : vector<2x1x32xf32> to vector<2x32xf32>
    %281 = vector.shape_cast %278 : vector<2x32xf32> to vector<2x1x32xf32>
    tpu.vector_store %arg13[%c0_55, %c4, %c0_56], %281 {strides = array<i32>} : memref<2x8x32xf32, #tpu.memory_space<vmem>>, vector<2x1x32xf32>,
    %282 = vector.extract_strided_slice %0 {offsets = [0, 5, 0], sizes = [2, 1, 16], strides = [1, 1, 1]} : vector<2x8x16xf32> to vector<2x1x16xf32>
    %283 = vector.shape_cast %282 : vector<2x1x16xf32> to vector<2x16xf32>
    %cst_57 = arith.constant dense<0.000000e+00> : vector<2x128xf32>
    %284 = tpu.matmul %283, %2, %cst_57 {dimension_numbers = #tpu.dot_dimension_numbers<[1], [0], [0], [1], [0, 0, 1, 1], [], []>} : vector<2x16xf32>, vector<16x128xf32>, vector<2x128xf32> -> vector<2x128xf32>
    %cst_58 = arith.constant dense<0.000000e+00> : vector<2x128xf32>
    %285 = tpu.matmul %276, %3, %cst_58 {dimension_numbers = #tpu.dot_dimension_numbers<[1], [0], [0], [1], [0, 0, 1, 1], [], []>} : vector<2x32xf32>, vector<32x128xf32>, vector<2x128xf32> -> vector<2x128xf32>
    %286 = arith.addf %284, %285 : vector<2x128xf32>
    %287 = vector.broadcast %4 : vector<1x128xf32> to vector<2x128xf32>
    %288 = arith.addf %286, %287 : vector<2x128xf32>
    %289 = vector.extract_strided_slice %288 {offsets = [0, 0], sizes = [2, 32], strides = [1, 1]} : vector<2x128xf32> to vector<2x32xf32>
    %290 = arith.negf %289 : vector<2x32xf32>
    %291 = math.exp %290 : vector<2x32xf32>
    %cst_59 = arith.constant 1.000000e+00 : f32
    %292 = vector.broadcast %cst_59 : f32 to vector<2x32xf32>
    %293 = arith.addf %292, %291 : vector<2x32xf32>
    %294 = arith.divf %292, %293 : vector<2x32xf32>
    %295 = vector.extract_strided_slice %288 {offsets = [0, 32], sizes = [2, 32], strides = [1, 1]} : vector<2x128xf32> to vector<2x32xf32>
    %296 = arith.negf %295 : vector<2x32xf32>
    %297 = math.exp %296 : vector<2x32xf32>
    %cst_60 = arith.constant 1.000000e+00 : f32
    %298 = vector.broadcast %cst_60 : f32 to vector<2x32xf32>
    %299 = arith.addf %298, %297 : vector<2x32xf32>
    %300 = arith.divf %298, %299 : vector<2x32xf32>
    %301 = vector.extract_strided_slice %288 {offsets = [0, 64], sizes = [2, 32], strides = [1, 1]} : vector<2x128xf32> to vector<2x32xf32>
    %302 = math.tanh %301 : vector<2x32xf32>
    %303 = vector.extract_strided_slice %288 {offsets = [0, 96], sizes = [2, 32], strides = [1, 1]} : vector<2x128xf32> to vector<2x32xf32>
    %304 = arith.negf %303 : vector<2x32xf32>
    %305 = math.exp %304 : vector<2x32xf32>
    %cst_61 = arith.constant 1.000000e+00 : f32
    %306 = vector.broadcast %cst_61 : f32 to vector<2x32xf32>
    %307 = arith.addf %306, %305 : vector<2x32xf32>
    %308 = arith.divf %306, %307 : vector<2x32xf32>
    %309 = arith.mulf %300, %269 : vector<2x32xf32>
    %310 = arith.mulf %294, %302 : vector<2x32xf32>
    %311 = arith.addf %309, %310 : vector<2x32xf32>
    %312 = math.tanh %311 : vector<2x32xf32>
    %313 = arith.mulf %308, %312 : vector<2x32xf32>
    %c5_i32 = arith.constant 5 : i32
    %314 = vector.broadcast %c5_i32 : i32 to vector<2x1xi32>
    %315 = arith.cmpi sgt, %1, %314 : vector<2x1xi32>
    %316 = arith.extui %315 : vector<2x1xi1> to vector<2x1xi32>
    %317 = arith.sitofp %316 : vector<2x1xi32> to vector<2x1xf32>
    %318 = vector.broadcast %317 : vector<2x1xf32> to vector<2x32xf32>
    %319 = arith.mulf %318, %311 : vector<2x32xf32>
    %cst_62 = arith.constant 1.000000e+00 : f32
    %320 = vector.broadcast %cst_62 : f32 to vector<2x1xf32>
    %321 = arith.subf %320, %317 : vector<2x1xf32>
    %322 = vector.broadcast %321 : vector<2x1xf32> to vector<2x32xf32>
    %323 = arith.mulf %322, %269 : vector<2x32xf32>
    %324 = arith.addf %319, %323 : vector<2x32xf32>
    %325 = vector.broadcast %317 : vector<2x1xf32> to vector<2x32xf32>
    %326 = arith.mulf %325, %313 : vector<2x32xf32>
    %cst_63 = arith.constant 1.000000e+00 : f32
    %327 = vector.broadcast %cst_63 : f32 to vector<2x1xf32>
    %328 = arith.subf %327, %317 : vector<2x1xf32>
    %329 = vector.broadcast %328 : vector<2x1xf32> to vector<2x32xf32>
    %330 = arith.mulf %329, %276 : vector<2x32xf32>
    %331 = arith.addf %326, %330 : vector<2x32xf32>
    %332 = vector.broadcast %317 : vector<2x1xf32> to vector<2x32xf32>
    %333 = arith.mulf %332, %313 : vector<2x32xf32>
    %c0_64 = arith.constant 0 : index
    %c5 = arith.constant 5 : index
    %c0_65 = arith.constant 0 : index
    %334 = vector.load %arg13[%c0_64, %c5, %c0_65] : memref<2x8x32xf32, #tpu.memory_space<vmem>>, vector<2x1x32xf32>
    %335 = vector.shape_cast %334 : vector<2x1x32xf32> to vector<2x32xf32>
    %336 = vector.shape_cast %333 : vector<2x32xf32> to vector<2x1x32xf32>
    tpu.vector_store %arg13[%c0_64, %c5, %c0_65], %336 {strides = array<i32>} : memref<2x8x32xf32, #tpu.memory_space<vmem>>, vector<2x1x32xf32>,
    %337 = vector.extract_strided_slice %0 {offsets = [0, 6, 0], sizes = [2, 1, 16], strides = [1, 1, 1]} : vector<2x8x16xf32> to vector<2x1x16xf32>
    %338 = vector.shape_cast %337 : vector<2x1x16xf32> to vector<2x16xf32>
    %cst_66 = arith.constant dense<0.000000e+00> : vector<2x128xf32>
    %339 = tpu.matmul %338, %2, %cst_66 {dimension_numbers = #tpu.dot_dimension_numbers<[1], [0], [0], [1], [0, 0, 1, 1], [], []>} : vector<2x16xf32>, vector<16x128xf32>, vector<2x128xf32> -> vector<2x128xf32>
    %cst_67 = arith.constant dense<0.000000e+00> : vector<2x128xf32>
    %340 = tpu.matmul %331, %3, %cst_67 {dimension_numbers = #tpu.dot_dimension_numbers<[1], [0], [0], [1], [0, 0, 1, 1], [], []>} : vector<2x32xf32>, vector<32x128xf32>, vector<2x128xf32> -> vector<2x128xf32>
    %341 = arith.addf %339, %340 : vector<2x128xf32>
    %342 = vector.broadcast %4 : vector<1x128xf32> to vector<2x128xf32>
    %343 = arith.addf %341, %342 : vector<2x128xf32>
    %344 = vector.extract_strided_slice %343 {offsets = [0, 0], sizes = [2, 32], strides = [1, 1]} : vector<2x128xf32> to vector<2x32xf32>
    %345 = arith.negf %344 : vector<2x32xf32>
    %346 = math.exp %345 : vector<2x32xf32>
    %cst_68 = arith.constant 1.000000e+00 : f32
    %347 = vector.broadcast %cst_68 : f32 to vector<2x32xf32>
    %348 = arith.addf %347, %346 : vector<2x32xf32>
    %349 = arith.divf %347, %348 : vector<2x32xf32>
    %350 = vector.extract_strided_slice %343 {offsets = [0, 32], sizes = [2, 32], strides = [1, 1]} : vector<2x128xf32> to vector<2x32xf32>
    %351 = arith.negf %350 : vector<2x32xf32>
    %352 = math.exp %351 : vector<2x32xf32>
    %cst_69 = arith.constant 1.000000e+00 : f32
    %353 = vector.broadcast %cst_69 : f32 to vector<2x32xf32>
    %354 = arith.addf %353, %352 : vector<2x32xf32>
    %355 = arith.divf %353, %354 : vector<2x32xf32>
    %356 = vector.extract_strided_slice %343 {offsets = [0, 64], sizes = [2, 32], strides = [1, 1]} : vector<2x128xf32> to vector<2x32xf32>
    %357 = math.tanh %356 : vector<2x32xf32>
    %358 = vector.extract_strided_slice %343 {offsets = [0, 96], sizes = [2, 32], strides = [1, 1]} : vector<2x128xf32> to vector<2x32xf32>
    %359 = arith.negf %358 : vector<2x32xf32>
    %360 = math.exp %359 : vector<2x32xf32>
    %cst_70 = arith.constant 1.000000e+00 : f32
    %361 = vector.broadcast %cst_70 : f32 to vector<2x32xf32>
    %362 = arith.addf %361, %360 : vector<2x32xf32>
    %363 = arith.divf %361, %362 : vector<2x32xf32>
    %364 = arith.mulf %355, %324 : vector<2x32xf32>
    %365 = arith.mulf %349, %357 : vector<2x32xf32>
    %366 = arith.addf %364, %365 : vector<2x32xf32>
    %367 = math.tanh %366 : vector<2x32xf32>
    %368 = arith.mulf %363, %367 : vector<2x32xf32>
    %c6_i32 = arith.constant 6 : i32
    %369 = vector.broadcast %c6_i32 : i32 to vector<2x1xi32>
    %370 = arith.cmpi sgt, %1, %369 : vector<2x1xi32>
    %371 = arith.extui %370 : vector<2x1xi1> to vector<2x1xi32>
    %372 = arith.sitofp %371 : vector<2x1xi32> to vector<2x1xf32>
    %373 = vector.broadcast %372 : vector<2x1xf32> to vector<2x32xf32>
    %374 = arith.mulf %373, %366 : vector<2x32xf32>
    %cst_71 = arith.constant 1.000000e+00 : f32
    %375 = vector.broadcast %cst_71 : f32 to vector<2x1xf32>
    %376 = arith.subf %375, %372 : vector<2x1xf32>
    %377 = vector.broadcast %376 : vector<2x1xf32> to vector<2x32xf32>
    %378 = arith.mulf %377, %324 : vector<2x32xf32>
    %379 = arith.addf %374, %378 : vector<2x32xf32>
    %380 = vector.broadcast %372 : vector<2x1xf32> to vector<2x32xf32>
    %381 = arith.mulf %380, %368 : vector<2x32xf32>
    %cst_72 = arith.constant 1.000000e+00 : f32
    %382 = vector.broadcast %cst_72 : f32 to vector<2x1xf32>
    %383 = arith.subf %382, %372 : vector<2x1xf32>
    %384 = vector.broadcast %383 : vector<2x1xf32> to vector<2x32xf32>
    %385 = arith.mulf %384, %331 : vector<2x32xf32>
    %386 = arith.addf %381, %385 : vector<2x32xf32>
    %387 = vector.broadcast %372 : vector<2x1xf32> to vector<2x32xf32>
    %388 = arith.mulf %387, %368 : vector<2x32xf32>
    %c0_73 = arith.constant 0 : index
    %c6 = arith.constant 6 : index
    %c0_74 = arith.constant 0 : index
    %389 = vector.load %arg13[%c0_73, %c6, %c0_74] : memref<2x8x32xf32, #tpu.memory_space<vmem>>, vector<2x1x32xf32>
    %390 = vector.shape_cast %389 : vector<2x1x32xf32> to vector<2x32xf32>
    %391 = vector.shape_cast %388 : vector<2x32xf32> to vector<2x1x32xf32>
    tpu.vector_store %arg13[%c0_73, %c6, %c0_74], %391 {strides = array<i32>} : memref<2x8x32xf32, #tpu.memory_space<vmem>>, vector<2x1x32xf32>,
    %392 = vector.extract_strided_slice %0 {offsets = [0, 7, 0], sizes = [2, 1, 16], strides = [1, 1, 1]} : vector<2x8x16xf32> to vector<2x1x16xf32>
    %393 = vector.shape_cast %392 : vector<2x1x16xf32> to vector<2x16xf32>
    %cst_75 = arith.constant dense<0.000000e+00> : vector<2x128xf32>
    %394 = tpu.matmul %393, %2, %cst_75 {dimension_numbers = #tpu.dot_dimension_numbers<[1], [0], [0], [1], [0, 0, 1, 1], [], []>} : vector<2x16xf32>, vector<16x128xf32>, vector<2x128xf32> -> vector<2x128xf32>
    %cst_76 = arith.constant dense<0.000000e+00> : vector<2x128xf32>
    %395 = tpu.matmul %386, %3, %cst_76 {dimension_numbers = #tpu.dot_dimension_numbers<[1], [0], [0], [1], [0, 0, 1, 1], [], []>} : vector<2x32xf32>, vector<32x128xf32>, vector<2x128xf32> -> vector<2x128xf32>
    %396 = arith.addf %394, %395 : vector<2x128xf32>
    %397 = vector.broadcast %4 : vector<1x128xf32> to vector<2x128xf32>
    %398 = arith.addf %396, %397 : vector<2x128xf32>
    %399 = vector.extract_strided_slice %398 {offsets = [0, 0], sizes = [2, 32], strides = [1, 1]} : vector<2x128xf32> to vector<2x32xf32>
    %400 = arith.negf %399 : vector<2x32xf32>
    %401 = math.exp %400 : vector<2x32xf32>
    %cst_77 = arith.constant 1.000000e+00 : f32
    %402 = vector.broadcast %cst_77 : f32 to vector<2x32xf32>
    %403 = arith.addf %402, %401 : vector<2x32xf32>
    %404 = arith.divf %402, %403 : vector<2x32xf32>
    %405 = vector.extract_strided_slice %398 {offsets = [0, 32], sizes = [2, 32], strides = [1, 1]} : vector<2x128xf32> to vector<2x32xf32>
    %406 = arith.negf %405 : vector<2x32xf32>
    %407 = math.exp %406 : vector<2x32xf32>
    %cst_78 = arith.constant 1.000000e+00 : f32
    %408 = vector.broadcast %cst_78 : f32 to vector<2x32xf32>
    %409 = arith.addf %408, %407 : vector<2x32xf32>
    %410 = arith.divf %408, %409 : vector<2x32xf32>
    %411 = vector.extract_strided_slice %398 {offsets = [0, 64], sizes = [2, 32], strides = [1, 1]} : vector<2x128xf32> to vector<2x32xf32>
    %412 = math.tanh %411 : vector<2x32xf32>
    %413 = vector.extract_strided_slice %398 {offsets = [0, 96], sizes = [2, 32], strides = [1, 1]} : vector<2x128xf32> to vector<2x32xf32>
    %414 = arith.negf %413 : vector<2x32xf32>
    %415 = math.exp %414 : vector<2x32xf32>
    %cst_79 = arith.constant 1.000000e+00 : f32
    %416 = vector.broadcast %cst_79 : f32 to vector<2x32xf32>
    %417 = arith.addf %416, %415 : vector<2x32xf32>
    %418 = arith.divf %416, %417 : vector<2x32xf32>
    %419 = arith.mulf %410, %379 : vector<2x32xf32>
    %420 = arith.mulf %404, %412 : vector<2x32xf32>
    %421 = arith.addf %419, %420 : vector<2x32xf32>
    %422 = math.tanh %421 : vector<2x32xf32>
    %423 = arith.mulf %418, %422 : vector<2x32xf32>
    %c7_i32 = arith.constant 7 : i32
    %424 = vector.broadcast %c7_i32 : i32 to vector<2x1xi32>
    %425 = arith.cmpi sgt, %1, %424 : vector<2x1xi32>
    %426 = arith.extui %425 : vector<2x1xi1> to vector<2x1xi32>
    %427 = arith.sitofp %426 : vector<2x1xi32> to vector<2x1xf32>
    %428 = vector.broadcast %427 : vector<2x1xf32> to vector<2x32xf32>
    %429 = arith.mulf %428, %423 : vector<2x32xf32>
    %cst_80 = arith.constant 1.000000e+00 : f32
    %430 = vector.broadcast %cst_80 : f32 to vector<2x1xf32>
    %431 = arith.subf %430, %427 : vector<2x1xf32>
    %432 = vector.broadcast %431 : vector<2x1xf32> to vector<2x32xf32>
    %433 = arith.mulf %432, %386 : vector<2x32xf32>
    %434 = arith.addf %429, %433 : vector<2x32xf32>
    %435 = vector.broadcast %427 : vector<2x1xf32> to vector<2x32xf32>
    %436 = arith.mulf %435, %423 : vector<2x32xf32>
    %c0_81 = arith.constant 0 : index
    %c7 = arith.constant 7 : index
    %c0_82 = arith.constant 0 : index
    %437 = vector.load %arg13[%c0_81, %c7, %c0_82] : memref<2x8x32xf32, #tpu.memory_space<vmem>>, vector<2x1x32xf32>
    %438 = vector.shape_cast %437 : vector<2x1x32xf32> to vector<2x32xf32>
    %439 = vector.shape_cast %436 : vector<2x32xf32> to vector<2x1x32xf32>
    tpu.vector_store %arg13[%c0_81, %c7, %c0_82], %439 {strides = array<i32>} : memref<2x8x32xf32, #tpu.memory_space<vmem>>, vector<2x1x32xf32>,
    %c0_83 = arith.constant 0 : index
    %c0_84 = arith.constant 0 : index
    %c0_85 = arith.constant 0 : index
    %440 = vector.load %arg13[%c0_83, %c0_84, %c0_85] : memref<2x8x32xf32, #tpu.memory_space<vmem>>, vector<2x8x32xf32>
    %cst_86 = arith.constant dense<0.000000e+00> : vector<2x8xf32>
    %441 = vector.multi_reduction <add>, %440, %cst_86 [2] : vector<2x8x32xf32> to vector<2x8xf32>
    %442 = vector.shape_cast %441 : vector<2x8xf32> to vector<2x8x1xf32>
    %cst_87 = arith.constant 3.200000e+01 : f32
    %443 = vector.broadcast %cst_87 : f32 to vector<2x8x1xf32>
    %444 = arith.divf %442, %443 : vector<2x8x1xf32>
    %445 = vector.broadcast %444 : vector<2x8x1xf32> to vector<2x8x32xf32>
    %446 = arith.subf %440, %445 : vector<2x8x32xf32>
    %447 = arith.mulf %446, %446 : vector<2x8x32xf32>
    %cst_88 = arith.constant dense<0.000000e+00> : vector<2x8xf32>
    %448 = vector.multi_reduction <add>, %447, %cst_88 [2] : vector<2x8x32xf32> to vector<2x8xf32>
    %449 = vector.shape_cast %448 : vector<2x8xf32> to vector<2x8x1xf32>
    %cst_89 = arith.constant 3.200000e+01 : f32
    %450 = vector.broadcast %cst_89 : f32 to vector<2x8x1xf32>
    %451 = arith.divf %449, %450 : vector<2x8x1xf32>
    %452 = vector.broadcast %444 : vector<2x8x1xf32> to vector<2x8x32xf32>
    %453 = arith.subf %440, %452 : vector<2x8x32xf32>
    %cst_90 = arith.constant 9.99999974E-6 : f32
    %454 = vector.broadcast %cst_90 : f32 to vector<2x8x1xf32>
    %455 = arith.addf %451, %454 : vector<2x8x1xf32>
    %456 = math.rsqrt %455 : vector<2x8x1xf32>
    %457 = vector.broadcast %456 : vector<2x8x1xf32> to vector<2x8x32xf32>
    %458 = arith.mulf %453, %457 : vector<2x8x32xf32>
    %c0_91 = arith.constant 0 : index
    %c0_92 = arith.constant 0 : index
    %459 = vector.load %arg5[%c0_91, %c0_92] : memref<1x32xf32, #tpu.memory_space<vmem>>, vector<1x32xf32>
    %460 = vector.shape_cast %459 : vector<1x32xf32> to vector<1x1x32xf32>
    %461 = vector.broadcast %460 : vector<1x1x32xf32> to vector<2x8x32xf32>
    %462 = arith.mulf %458, %461 : vector<2x8x32xf32>
    %c0_93 = arith.constant 0 : index
    %c0_94 = arith.constant 0 : index
    %463 = vector.load %arg6[%c0_93, %c0_94] : memref<1x32xf32, #tpu.memory_space<vmem>>, vector<1x32xf32>
    %464 = vector.shape_cast %463 : vector<1x32xf32> to vector<1x1x32xf32>
    %465 = vector.broadcast %464 : vector<1x1x32xf32> to vector<2x8x32xf32>
    %466 = arith.addf %462, %465 : vector<2x8x32xf32>
    %c0_95 = arith.constant 0 : index
    %c0_96 = arith.constant 0 : index
    %467 = vector.load %arg7[%c0_95, %c0_96] : memref<32x64xf32, #tpu.memory_space<vmem>>, vector<32x64xf32>
    %c0_97 = arith.constant 0 : index
    %c0_98 = arith.constant 0 : index
    %468 = vector.load %arg8[%c0_97, %c0_98] : memref<1x64xf32, #tpu.memory_space<vmem>>, vector<1x64xf32>
    %469 = vector.extract_strided_slice %466 {offsets = [0, 0, 0], sizes = [1, 8, 32], strides = [1, 1, 1]} : vector<2x8x32xf32> to vector<1x8x32xf32>
    %470 = vector.shape_cast %469 : vector<1x8x32xf32> to vector<8x32xf32>
    %cst_99 = arith.constant dense<0.000000e+00> : vector<8x64xf32>
    %471 = tpu.matmul %470, %467, %cst_99 {dimension_numbers = #tpu.dot_dimension_numbers<[1], [0], [0], [1], [0, 0, 1, 1], [], []>} : vector<8x32xf32>, vector<32x64xf32>, vector<8x64xf32> -> vector<8x64xf32>
    %472 = vector.broadcast %468 : vector<1x64xf32> to vector<8x64xf32>
    %473 = arith.addf %471, %472 : vector<8x64xf32>
    %c0_100 = arith.constant 0 : index
    %c0_101 = arith.constant 0 : index
    %c0_102 = arith.constant 0 : index
    %474 = vector.load %arg11[%c0_100, %c0_101, %c0_102] : memref<2x8x64xf32, #tpu.memory_space<vmem>>, vector<1x8x64xf32>
    %475 = vector.shape_cast %474 : vector<1x8x64xf32> to vector<8x64xf32>
    %476 = vector.shape_cast %473 : vector<8x64xf32> to vector<1x8x64xf32>
    tpu.vector_store %arg11[%c0_100, %c0_101, %c0_102], %476 {strides = array<i32>} : memref<2x8x64xf32, #tpu.memory_space<vmem>>, vector<1x8x64xf32>,
    %477 = vector.extract_strided_slice %466 {offsets = [1, 0, 0], sizes = [1, 8, 32], strides = [1, 1, 1]} : vector<2x8x32xf32> to vector<1x8x32xf32>
    %478 = vector.shape_cast %477 : vector<1x8x32xf32> to vector<8x32xf32>
    %cst_103 = arith.constant dense<0.000000e+00> : vector<8x64xf32>
    %479 = tpu.matmul %478, %467, %cst_103 {dimension_numbers = #tpu.dot_dimension_numbers<[1], [0], [0], [1], [0, 0, 1, 1], [], []>} : vector<8x32xf32>, vector<32x64xf32>, vector<8x64xf32> -> vector<8x64xf32>
    %480 = vector.broadcast %468 : vector<1x64xf32> to vector<8x64xf32>
    %481 = arith.addf %479, %480 : vector<8x64xf32>
    %c1_104 = arith.constant 1 : index
    %c0_105 = arith.constant 0 : index
    %c0_106 = arith.constant 0 : index
    %482 = vector.load %arg11[%c1_104, %c0_105, %c0_106] : memref<2x8x64xf32, #tpu.memory_space<vmem>>, vector<1x8x64xf32>
    %483 = vector.shape_cast %482 : vector<1x8x64xf32> to vector<8x64xf32>
    %484 = vector.shape_cast %481 : vector<8x64xf32> to vector<1x8x64xf32>
    tpu.vector_store %arg11[%c1_104, %c0_105, %c0_106], %484 {strides = array<i32>} : memref<2x8x64xf32, #tpu.memory_space<vmem>>, vector<1x8x64xf32>,
    %c0_107 = arith.constant 0 : index
    %c0_108 = arith.constant 0 : index
    %485 = vector.load %arg9[%c0_107, %c0_108] : memref<32x64xf32, #tpu.memory_space<vmem>>, vector<32x64xf32>
    %cst_109 = arith.constant dense<0.000000e+00> : vector<2x64xf32>
    %486 = tpu.matmul %434, %485, %cst_109 {dimension_numbers = #tpu.dot_dimension_numbers<[1], [0], [0], [1], [0, 0, 1, 1], [], []>} : vector<2x32xf32>, vector<32x64xf32>, vector<2x64xf32> -> vector<2x64xf32>
    %c0_110 = arith.constant 0 : index
    %c0_111 = arith.constant 0 : index
    %487 = vector.load %arg10[%c0_110, %c0_111] : memref<1x64xf32, #tpu.memory_space<vmem>>, vector<1x64xf32>
    %488 = vector.broadcast %487 : vector<1x64xf32> to vector<2x64xf32>
    %489 = arith.addf %486, %488 : vector<2x64xf32>
    %c0_112 = arith.constant 0 : index
    %c0_113 = arith.constant 0 : index
    %490 = vector.load %arg12[%c0_112, %c0_113] : memref<2x64xf32, #tpu.memory_space<vmem>>, vector<2x64xf32>
    tpu.vector_store %arg12[%c0_112, %c0_113], %489 {strides = array<i32>} : memref<2x64xf32, #tpu.memory_space<vmem>>, vector<2x64xf32>,
    return
  }
}

</mosaic_0001>

<bundles_post_ra>
// kernel: tpu_custom_call.1
= control target key start
LH: loop header
LB: loop body
LE: loop exit
PB: predicated region body
PF: predicated region fallthrough
CT: control target
= control target key end

     0   :  { %18 = vsyncpa [#allocation4], 0  ;;  %s3391_s0 = inlined_call_operand.hbm [shape: f32[2,8,16], index: 0, kind: input, shape index: {}]   ;;  %s3392_s1 = inlined_call_operand.vmem [shape: s32[2,1], index: 1, kind: input, shape index: {}]   ;;  %s3393_s2 = inlined_call_operand.hbm [shape: f32[16,128], index: 2, kind: input, shape index: {}]   ;;  %s3394_s3 = inlined_call_operand.hbm [shape: f32[32,128], index: 3, kind: input, shape index: {}]   ;;  %s3395_s4 = inlined_call_operand.vmem [shape: f32[1,128], index: 4, kind: input, shape index: {}]   ;;  %s3396_s5 = inlined_call_operand.vmem [shape: f32[1,32], index: 5, kind: input, shape index: {}]   ;;  %s3397_s6 = inlined_call_operand.vmem [shape: f32[1,32], index: 6, kind: input, shape index: {}]   ;;  %s3398_s7 = inlined_call_operand.hbm [shape: f32[32,64], index: 7, kind: input, shape index: {}]   ;;  %s3399_s8 = inlined_call_operand.vmem [shape: f32[1,64], index: 8, kind: input, shape index: {}]   ;;  %s3400_s9 = inlined_call_operand.hbm [shape: f32[32,64], index: 9, kind: input, shape index: {}]   ;;  %s3401_s10 = inlined_call_operand.vmem [shape: f32[1,64], index: 10, kind: input, shape index: {}]   ;;  %s3402_s11 = inlined_call_operand.hbm [shape: f32[2,8,64], index: 11, kind: output, shape index: {0}]   ;;  %s3403_s12 = inlined_call_operand.hbm [shape: f32[2,64], index: 12, kind: output, shape index: {1}]  }
   0x1   :  { %19 = vsyncpa [#allocation7], 0 }
   0x2   :  { %20 = vsyncpa [#allocation10], 0 }
   0x3   :  { %21 = vsyncpa [#allocation5], 0 }
   0x4   :  { %22 = vsyncpa [#allocation14], 0  ;;  %s2855_s21 = smov [#allocation6]   ;;  %s2856_s23 = smov [#allocation9]  }
   0x5   :  { %s42_s22 = sshll.u32 %s2855_s21, 4  ;;  %s72_s24 = sshll.u32 %s2856_s23, 4  ;;  %s43_s22 = int_to_ptr.vmem [resolvable:$true] %s42_s22  ;;  %s73_s24 = int_to_ptr.vmem [resolvable:$true] %s72_s24 }
   0x6   :  { %s2713_s25 = scalar_lea.vmem %s43_s22, 256  ;;  %p2718_p1 = scmp.lt.s32.totalorder %s43_s22, %s43_s22 }
   0x7   :  { %p2714_p0 = scmp.ne.s32.totalorder %s43_s22, %s2713_s25  ;;  %p2719_p2 = scmp.lt.s32.totalorder %s2713_s25, %s2713_s25 }
   0x9   :  { %p2720_p3 = por %p2719_p2, %p2718_p1 }
   0xb   :  { %p2721_p4 = pnand %p2720_p3, %p2714_p0 }
   0xd   :  { %2724 = shalt.err (!%p2721_p4)
}
   0xe   :  { %s2857_s26 = smov 128   ;;  %s2858_s27 = smov 8  }
   0xf   :  { %48 = dma.hbm_to_vmem [thread:$0]  %s3393_s2, 256, %s43_s22, [#allocation7], %s2857_s26, %s2857_s26, %s2858_s27  }
  0x10   :  { %s2733_s30 = scalar_lea.vmem %s73_s24, 512  ;;  %p2738_p6 = scmp.lt.s32.totalorder %s73_s24, %s73_s24 }
  0x11   :  { %p2734_p5 = scmp.ne.s32.totalorder %s73_s24, %s2733_s30  ;;  %p2739_p7 = scmp.lt.s32.totalorder %s2733_s30, %s2733_s30 }
  0x13   :  { %p2740_p8 = por %p2739_p7, %p2738_p6 }
  0x15   :  { %p2741_p9 = pnand %p2740_p8, %p2734_p5 }
  0x17   :  { %2744 = shalt.err (!%p2741_p9)
}
  0x18   :  { %78 = dma.hbm_to_vmem [thread:$0]  %s3398_s7, 512, %s73_s24, [#allocation10], %s2857_s26, %s2857_s26, %s2858_s27  }
  0x19   :  { %s2859_s15 = smov [#allocation3]   ;;  %s2860_s17 = smov [#allocation8]  }
  0x1a   :  { %s28_s16 = sshll.u32 %s2859_s15, 4  ;;  %s54_s18 = sshll.u32 %s2860_s17, 4  ;;  %s29_s16 = int_to_ptr.vmem [resolvable:$true] %s28_s16  ;;  %s55_s18 = int_to_ptr.vmem [resolvable:$true] %s54_s18 }
  0x1b   :  { %s2753_s2 = scalar_lea.vmem %s29_s16, 256  ;;  %p2758_p11 = scmp.lt.s32.totalorder %s29_s16, %s29_s16 }
  0x1c   :  { %p2754_p10 = scmp.ne.s32.totalorder %s29_s16, %s2753_s2  ;;  %p2759_p12 = scmp.lt.s32.totalorder %s2753_s2, %s2753_s2 }
  0x1e   :  { %p2760_p13 = por %p2759_p12, %p2758_p11 }
  0x20   :  { %p2761_p0 = pnand %p2760_p13, %p2754_p10 }
  0x22   :  { %2764 = shalt.err (!%p2761_p0)
}
  0x23   :  { %34 = dma.hbm_to_vmem [thread:$0]  %s3391_s0, 256, %s29_s16, [#allocation4], %s2857_s26, %s2857_s26, %s2858_s27  }
  0x24   :  { %s2773_s7 = scalar_lea.vmem %s55_s18, 512  ;;  %p2778_p2 = scmp.lt.s32.totalorder %s55_s18, %s55_s18 }
  0x25   :  { %p2774_p1 = scmp.ne.s32.totalorder %s55_s18, %s2773_s7  ;;  %p2779_p3 = scmp.lt.s32.totalorder %s2773_s7, %s2773_s7 }
  0x27   :  { %p2780_p4 = por %p2779_p3, %p2778_p2 }
  0x29   :  { %p2781_p5 = pnand %p2780_p4, %p2774_p1 }
  0x2b   :  { %2784 = shalt.err (!%p2781_p5)
}
  0x2c   :  { %60 = dma.hbm_to_vmem [thread:$0]  %s3394_s3, 512, %s55_s18, [#allocation7], %s2857_s26, %s2857_s26, %s2858_s27  }
  0x2d   :  { %s2861_s23 = smov [#allocation11]  }
  0x2e   :  { %s86_s24 = sshll.u32 %s2861_s23, 4  ;;  %s87_s24 = int_to_ptr.vmem [resolvable:$true] %s86_s24 }
  0x2f   :  { %s2793_s25 = scalar_lea.vmem %s87_s24, 512  ;;  %p2798_p7 = scmp.lt.s32.totalorder %s87_s24, %s87_s24 }
  0x30   :  { %p2794_p6 = scmp.ne.s32.totalorder %s87_s24, %s2793_s25  ;;  %p2799_p8 = scmp.lt.s32.totalorder %s2793_s25, %s2793_s25 }
  0x32   :  { %p2800_p9 = por %p2799_p8, %p2798_p7 }
  0x34   :  { %p2801_p10 = pnand %p2800_p9, %p2794_p6 }
  0x36   :  { %2804 = shalt.err (!%p2801_p10)
}
  0x37   :  { %92 = dma.hbm_to_vmem [thread:$0]  %s3400_s9, 512, %s87_s24, [#allocation10], %s2857_s26, %s2857_s26, %s2858_s27  }
  0x38   :  { %2845 = dma.done.wait [#allocation4], 256  }
  0x39   :  { %2846 = vsyncadd [#allocation4], 4294967040 }
  0x3a   :  { %2847 = dma.done.wait [#allocation7], 768  }
  0x3b   :  { %2848 = vsyncadd [#allocation7], 4294966528 }
  0x3c   :  { %2849 = dma.done.wait [#allocation10], 1024  }
  0x3d   :  { %2850 = vsyncadd [#allocation10], 4294966272  ;;  %v2862_v0 = vmov 0.0   ;;  %vm2863_vm0 = vmmov 0   ;;  %v2971_v1 = vld [vmem:[#allocation8 + $0x18] sm:$0xff]  ;;  %v2973_v2 = vld [vmem:[#allocation8 + $0x10] sm:$0xff] }
  0x3e   :  { %2443 = vmatprep.subr.mxu0 %v2862_v0  ;;  %2454 = vmatprep.subr.mxu1 %v2862_v0  ;;  %v2975_v3 = vld [vmem:[#allocation6 + $0x8] sm:$0xff]  ;;  %v2979_v4 = vld [vmem:[#allocation6] sm:$0xff]  ;;  %v2983_v5 = vld [vmem:[#allocation8 + $0x8] sm:$0xff]  ;;  %vm197_vm1 = vcmask 1041409   ;;  %vm199_vm2 = vcmask 130048   ;;  %v2864_v12 = vmov 0  }
  0x3f   :  { %2458 = vmatprep.mubr.msk.f32.mxu1 %vm2863_vm0, %v2862_v0  ;;  %2451 = vmatprep.mubr.msk.f32.mxu0 %vm2863_vm0, %v2862_v0  ;;  %v2985_v6 = vld [vmem:[#allocation3] sm:$0xff]  ;;  %v2987_v7 = vld [vmem:[#allocation3 + $0x8] sm:$0xff]  ;;  %v3027_v11 = vld [vmem:[%s3392_s1] sm:$0x3]  ;;  %s2865_s1 = smov 64   ;;  %vm120_vm4 = vcmask 261120  }
  0x40   :  { %2444 = vmatpush3.msra.mxu0 %v2971_v1  ;;  %2455 = vmatpush3.msra.mxu1 %v2975_v3  ;;  %v196_v8 = vrot.slane %v2987_v7, 7  ;;  %v2993_v9 = vld [vmem:[#allocation8] sm:$0xff]  ;;  %vm303_vm3 = vcmp.gt.s32.totalorder %v3027_v11, 0  ;;  %v3034_v16 = vld [vmem:[%s3395_s4] ss:$0 sm:$0xff]  ;;  %s2866_s4 = smov 32  }
  0x41   :  { %2445 = vmatprep.subr.mxu0 %v2862_v0  ;;  %2456 = vmatprep.subr.mxu1 %v2862_v0  ;;  %v2328_v13 = vsel %vm303_vm3, 1.0, %v2862_v0  ;;  %v437_v40 = vrot.slane %v2985_v6, 1  ;;  %vm536_vm5 = vcmp.gt.s32.totalorder %v3027_v11, 1  ;;  %v670_v63 = vrot.slane %v2985_v6, 2  ;;  %s2868_s2 = smov [#allocation12]   ;;  %s2869_s20 = smov [#allocation13]  }
  0x42   :  { %2446 = vmatpush3.msra.mxu0 %v2973_v2  ;;  %2457 = vmatpush3.msra.mxu1 %v2979_v4  ;;  %v198_v10 = vsel %vm197_vm1, %v196_v8, %v2985_v6  ;;  %v312_v14 = vsub.f32 1.0, %v2328_v13  ;;  %v2332_v50 = vsel %vm536_vm5, 1.0, %v2862_v0  ;;  %v671_v8 = vrot.slane %v2987_v7, 1  ;;  %s2297_s19 = sshll.u32 %s2868_s2, 4  ;;  %s2310_s7 = sshll.u32 %s2869_s20, 4  ;;  %s2298_s19 = int_to_ptr.vmem [resolvable:$true] %s2297_s19  ;;  %s2311_s7 = int_to_ptr.vmem [resolvable:$true] %s2310_s7 }
  0x43   :  { %2447 = vmatprep.subr.mxu0 %v2862_v0  ;;  %2461 = vmatprep.subr.mxu1 %v2862_v0  ;;  %v438_v42 = vsel %vm197_vm1, %v2987_v7, %v437_v40  ;;  %v545_v57 = vsub.f32 1.0, %v2332_v50  ;;  %vm770_vm6 = vcmp.gt.s32.totalorder %v3027_v11, 2  ;;  %vm1004_vm7 = vcmp.gt.s32.totalorder %v3027_v11, 3  ;;  %p2810_p12 = scmp.lt.s32.totalorder %s2298_s19, %s2298_s19 }
  0x44   :  { %2448 = vmatpush3.msra.mxu0 %v2983_v5  ;;  %2459 = vmatmul.mubr.msk.f32.vlgmr.msra.gmra.mxu1 %vm199_vm2, %v198_v10  ;;  %v672_v10 = vsel %vm197_vm1, %v671_v8, %v670_v63  ;;  %v2340_v63 = vsel %vm1004_vm7, 1.0, %v2862_v0  ;;  %vm1238_vm8 = vcmp.gt.s32.totalorder %v3027_v11, 4  ;;  %vm1472_vm9 = vcmp.gt.s32.totalorder %v3027_v11, 5 }
  0x45   :  { %2449 = vmatprep.subr.mxu0 %v2862_v0  ;;  %2462 = vmatpush3.msra.mxu1 %v2971_v1  ;;  %vm1706_vm10 = vcmp.gt.s32.totalorder %v3027_v11, 6  ;;  %vm1940_vm11 = vcmp.gt.s32.totalorder %v3027_v11, 7  ;;  %vm359_vm12 = vcmask 253952   ;;  %vm2127_vm13 = vcmask 523264  }
  0x46   :  { %2450 = vmatpush3.msra.mxu0 %v2993_v9  ;;  %2463 = vmatprep.subr.mxu1 %v2862_v0  ;;  %vm2290_vm14 = vcmask 517120  }
  0x47   :  { %2452 = vmatmul.mubr.f32.vlgmr.msra.gmra.mxu0 %v2862_v0  ;;  %2464 = vmatpush3.msra.mxu1 %v2973_v2 }
  0x48   :  { %2469 = vmatprep.mubr.msk.f32.mxu1 %vm2863_vm0, %v2862_v0  ;;  %2465 = vmatprep.subr.mxu1 %v2862_v0 }
  0x49   :  { %2479 = vmatprep.subr.mxu0 %v2862_v0  ;;  %2466 = vmatpush3.msra.mxu1 %v2983_v5 }
  0x4a   :  { %2480 = vmatpush3.msra.mxu0 %v2971_v1  ;;  %2467 = vmatprep.subr.mxu1 %v2862_v0 }
  0x4b   :  { %2481 = vmatprep.subr.mxu0 %v2862_v0  ;;  %2468 = vmatpush3.msra.mxu1 %v2993_v9 }
  0x4c   :  { %2482 = vmatpush3.msra.mxu0 %v2973_v2  ;;  %2472 = vmatprep.subr.mxu1 %v2862_v0 }
  0x4d   :  { %2483 = vmatprep.subr.mxu0 %v2862_v0  ;;  %2487 = vmatprep.mubr.msk.f32.mxu0 %vm2863_vm0, %v2862_v0 }
  0x4e   :  { %2484 = vmatpush3.msra.mxu0 %v2983_v5  ;;  %2635 = vset.pattern.permute.xlu1 %v2864_v12 }
  0x4f   :  { %2485 = vmatprep.subr.mxu0 %v2862_v0  ;;  %2636 = vset.pattern.permute.xlu0 %v2864_v12 }
  0x50   :  { %2486 = vmatpush3.msra.mxu0 %v2993_v9  ;;  %308 = vperm.xlu1 %2635, %v2328_v13  }
  0x51   :  { %2508 = vmatprep.subr.mxu0 %v2862_v0 }
  0x54   :  { %315 = vperm.xlu1 %2635, %v312_v14  }
  0xcb   :  { %v309_v33 = vpop.permute.xlu1 %308 }
  0xcf   :  { %v316_v34 = vpop.permute.xlu1 %315 }
  0xd0   :  { %v318_v37 = vmul.f32 0.0, %v316_v34 }
 0x104   :  { %v268_v15 = vpop.f32.mrf.mxu1 }
 0x106   :  { %v2460_v18 = vpop.f32.mrf.mxu1 }
 0x107   :  { %v190_v17 = vpop.f32.mrf.mxu0 }
 0x108   :  { %v269_v19 = vadd.f32 %v268_v15, %v190_v17 }
 0x109   :  { %v2453_v20 = vpop.f32.mrf.mxu0 }
 0x10a   :  { %v278_v21 = vadd.f32 %v3034_v16, %v269_v19 }
 0x10c   :  { %2637 = vtanh.f32 %v278_v21  ;;  %v2327_v23 = vmul.f32 -1.442695, %v278_v21 }
 0x10e   :  { %2639 = vpow2.f32 %v2327_v23 }
 0x119   :  { %v2638_v22 = vpop.eup %2637 }
 0x11a   :  { %288 = vrot.lane.b32.xlu0 %v2638_v22, %s2865_s1 }
 0x11b   :  { %v2640_v24 = vpop.eup %2639 }
 0x11c   :  { %v282_v25 = vadd.f32 1.0, %v2640_v24 }
 0x11e   :  { %2641 = vrcp.f32 %v282_v25 }
 0x12b   :  { %v2642_v26 = vpop.eup %2641 }
 0x12c   :  { %v286_v29 = vmul.f32 0.0, %v2642_v26 }
 0x18c   :  { %v289_v27 = vpop.permute.xlu0 %288 }
 0x18d   :  { %v291_v28 = vmul.f32 %v2642_v26, %v289_v27 }
 0x18f   :  { %293 = vrot.lane.b32.xlu0 %v291_v28, %s2866_s4 }
 0x201   :  { %v294_v30 = vpop.permute.xlu0 %293 }
 0x202   :  { %v296_v31 = vadd.f32 %v294_v30, %v286_v29  ;;  %v2336_v29 = vsel %vm770_vm6, 1.0, %v2862_v0 }
 0x204   :  { %2643 = vtanh.f32 %v296_v31  ;;  %v311_v58 = vmul.f32 %v309_v33, %v296_v31 }
 0x206   :  { %v319_v59 = vadd.f32 %v318_v37, %v311_v58 }
 0x211   :  { %v2644_v32 = vpop.eup %2643 }
 0x212   :  { %299 = vrot.lane.b32.xlu0 %v2644_v32, %s2865_s1 }
 0x284   :  { %v300_v35 = vpop.permute.xlu0 %299 }
 0x285   :  { %v302_v36 = vmul.f32 %v2642_v26, %v300_v35 }
 0x287   :  { %v3040_v38 = vmul.f32 %v309_v33, %v302_v36  ;;  %v779_v36 = vsub.f32 1.0, %v2336_v29 }
 0x289   :  { %v3043_v39 = vadd.f32 %v3040_v38, %v318_v37 }
 0x28b   :  { %363 = vrot.lane.b32.xlu1 %v3043_v39, %s2866_s4 }
 0x2fd   :  { %v364_v41 = vpop.permute.xlu1 %363 }
 0x2fe   :  { %2470 = vmatmul.mubr.msk.f32.vlgmr.msra.gmra.mxu1 %vm120_vm4, %v364_v41 }
 0x2ff   :  { %2473 = vmatpush3.msra.mxu1 %v2975_v3  ;;  %2476 = vmatprep.mubr.msk.f32.mxu1 %vm2863_vm0, %v2862_v0 }
 0x300   :  { %2474 = vmatprep.subr.mxu1 %v2862_v0 }
 0x301   :  { %2475 = vmatpush3.msra.mxu1 %v2979_v4 }
 0x302   :  { %2477 = vmatmul.mubr.msk.f32.vlgmr.msra.gmra.mxu1 %vm199_vm2, %v438_v42  ;;  %2490 = vmatprep.subr.mxu1 %v2862_v0 }
 0x303   :  { %2491 = vmatpush3.msra.mxu1 %v2975_v3  ;;  %2494 = vmatprep.mubr.msk.f32.mxu1 %vm2863_vm0, %v2862_v0 }
 0x304   :  { %2492 = vmatprep.subr.mxu1 %v2862_v0 }
 0x305   :  { %2493 = vmatpush3.msra.mxu1 %v2979_v4 }
 0x306   :  { %2497 = vmatprep.subr.mxu1 %v2862_v0  ;;  %2495 = vmatmul.mubr.msk.f32.vlgmr.msra.gmra.mxu1 %vm199_vm2, %v672_v10 }
 0x307   :  { %2498 = vmatpush3.msra.mxu1 %v2971_v1  ;;  %2505 = vmatprep.mubr.msk.f32.mxu1 %vm2863_vm0, %v2862_v0 }
 0x308   :  { %2499 = vmatprep.subr.mxu1 %v2862_v0 }
 0x309   :  { %2500 = vmatpush3.msra.mxu1 %v2973_v2 }
 0x30a   :  { %2501 = vmatprep.subr.mxu1 %v2862_v0 }
 0x30b   :  { %2502 = vmatpush3.msra.mxu1 %v2983_v5 }
 0x30c   :  { %2503 = vmatprep.subr.mxu1 %v2862_v0 }
 0x30d   :  { %2504 = vmatpush3.msra.mxu1 %v2993_v9 }
 0x30e   :  { %2526 = vmatprep.subr.mxu1 %v2862_v0 }
 0x3be   :  { %v433_v43 = vpop.f32.mrf.mxu1 }
 0x3c0   :  { %v2471_v44 = vpop.f32.mrf.mxu1 }
 0x3c1   :  { %v904_v44 = vrot.slane %v2985_v6, 3 }
 0x3c2   :  { %v507_v45 = vpop.f32.mrf.mxu1 }
 0x3c3   :  { %v508_v46 = vadd.f32 %v507_v45, %v433_v43  ;;  %v905_v45 = vrot.slane %v2987_v7, 2 }
 0x3c4   :  { %v2478_v47 = vpop.f32.mrf.mxu1 }
 0x3c5   :  { %v511_v48 = vadd.f32 %v3034_v16, %v508_v46  ;;  %v906_v46 = vsel %vm197_vm1, %v905_v45, %v904_v44  ;;  %v2344_v45 = vsel %vm1238_vm8, 1.0, %v2862_v0 }
 0x3c6   :  { %v741_v21 = vpop.f32.mrf.mxu1 }
 0x3c7   :  { %2645 = vtanh.f32 %v511_v48  ;;  %v2331_v51 = vmul.f32 -1.442695, %v511_v48 }
 0x3c8   :  { %v2496_v22 = vpop.f32.mrf.mxu1 }
 0x3c9   :  { %2647 = vpow2.f32 %v2331_v51 }
 0x3d4   :  { %v2646_v49 = vpop.eup %2645 }
 0x3d5   :  { %521 = vrot.lane.b32.xlu0 %v2646_v49, %s2865_s1 }
 0x3d6   :  { %v2648_v52 = vpop.eup %2647 }
 0x3d7   :  { %v515_v53 = vadd.f32 1.0, %v2648_v52 }
 0x3d9   :  { %541 = vperm.xlu0 %2636, %v2332_v50   ;;  %2649 = vrcp.f32 %v515_v53 }
 0x3e6   :  { %v2650_v54 = vpop.eup %2649 }
 0x3e7   :  { %v519_v60 = vmul.f32 %v2650_v54, %v319_v59 }
 0x447   :  { %v522_v55 = vpop.permute.xlu0 %521 }
 0x448   :  { %v524_v56 = vmul.f32 %v2650_v54, %v522_v55 }
 0x44a   :  { %526 = vrot.lane.b32.xlu1 %v524_v56, %s2866_s4 }
 0x44e   :  { %548 = vperm.xlu1 %2635, %v545_v57  }
 0x454   :  { %v542_v17 = vpop.permute.xlu0 %541 }
 0x4bc   :  { %v527_v61 = vpop.permute.xlu1 %526 }
 0x4bd   :  { %v529_v62 = vadd.f32 %v527_v61, %v519_v60 }
 0x4bf   :  { %2651 = vtanh.f32 %v529_v62 }
 0x4c9   :  { %v549_v13 = vpop.permute.xlu1 %548 }
 0x4ca   :  { %v554_v18 = vmul.f32 %v549_v13, %v3043_v39  ;;  %v551_v37 = vmul.f32 %v549_v13, %v319_v59  ;;  %v544_v39 = vmul.f32 %v542_v17, %v529_v62 }
 0x4cc   :  { %v2652_v12 = vpop.eup %2651  ;;  %v552_v40 = vadd.f32 %v551_v37, %v544_v39 }
 0x4cd   :  { %532 = vrot.lane.b32.xlu1 %v2652_v12, %s2865_s1 }
 0x53f   :  { %v533_v14 = vpop.permute.xlu1 %532 }
 0x540   :  { %v535_v15 = vmul.f32 %v2650_v54, %v533_v14 }
 0x542   :  { %v3085_v19 = vmul.f32 %v542_v17, %v535_v15  ;;  %v1013_v17 = vsub.f32 1.0, %v2340_v63 }
 0x544   :  { %v555_v20 = vadd.f32 %v554_v18, %v3085_v19 }
 0x546   :  { %596 = vrot.lane.b32.xlu0 %v555_v20, %s2866_s4 }
 0x5b8   :  { %v597_v23 = vpop.permute.xlu0 %596 }
 0x5b9   :  { %2488 = vmatmul.mubr.msk.f32.vlgmr.msra.gmra.mxu0 %vm120_vm4, %v597_v23 }
 0x5ba   :  { %2509 = vmatpush3.msra.mxu0 %v2975_v3  ;;  %2512 = vmatprep.mubr.msk.f32.mxu0 %vm2863_vm0, %v2862_v0 }
 0x5bb   :  { %2510 = vmatprep.subr.mxu0 %v2862_v0 }
 0x5bc   :  { %2511 = vmatpush3.msra.mxu0 %v2979_v4 }
 0x5bd   :  { %2515 = vmatprep.subr.mxu0 %v2862_v0  ;;  %2513 = vmatmul.mubr.msk.f32.vlgmr.msra.gmra.mxu0 %vm199_vm2, %v906_v46 }
 0x5be   :  { %2516 = vmatpush3.msra.mxu0 %v2971_v1  ;;  %2523 = vmatprep.mubr.msk.f32.mxu0 %vm2863_vm0, %v2862_v0 }
 0x5bf   :  { %2517 = vmatprep.subr.mxu0 %v2862_v0 }
 0x5c0   :  { %2518 = vmatpush3.msra.mxu0 %v2973_v2 }
 0x5c1   :  { %2519 = vmatprep.subr.mxu0 %v2862_v0 }
 0x5c2   :  { %2520 = vmatpush3.msra.mxu0 %v2983_v5 }
 0x5c3   :  { %2521 = vmatprep.subr.mxu0 %v2862_v0 }
 0x5c4   :  { %2522 = vmatpush3.msra.mxu0 %v2993_v9 }
 0x5c5   :  { %2544 = vmatprep.subr.mxu0 %v2862_v0 }
 0x679   :  { %v666_v24 = vpop.f32.mrf.mxu0 }
 0x67a   :  { %v742_v25 = vadd.f32 %v741_v21, %v666_v24 }
 0x67b   :  { %v2489_v26 = vpop.f32.mrf.mxu0 }
 0x67c   :  { %v745_v27 = vadd.f32 %v3034_v16, %v742_v25  ;;  %v1138_v25 = vrot.slane %v2985_v6, 4  ;;  %v1139_v26 = vrot.slane %v2987_v7, 3 }
 0x67d   :  { %v975_v55 = vpop.f32.mrf.mxu0 }
 0x67e   :  { %2653 = vtanh.f32 %v745_v27  ;;  %v2335_v30 = vmul.f32 -1.442695, %v745_v27  ;;  %v1140_v27 = vsel %vm197_vm1, %v1139_v26, %v1138_v25 }
 0x67f   :  { %v2514_v56 = vpop.f32.mrf.mxu0 }
 0x680   :  { %2655 = vpow2.f32 %v2335_v30 }
 0x68b   :  { %v2654_v28 = vpop.eup %2653 }
 0x68c   :  { %755 = vrot.lane.b32.xlu1 %v2654_v28, %s2865_s1 }
 0x68d   :  { %v2656_v31 = vpop.eup %2655 }
 0x68e   :  { %v749_v32 = vadd.f32 1.0, %v2656_v31 }
 0x690   :  { %775 = vperm.xlu1 %2635, %v2336_v29   ;;  %2657 = vrcp.f32 %v749_v32 }
 0x69d   :  { %v2658_v33 = vpop.eup %2657 }
 0x69e   :  { %v753_v41 = vmul.f32 %v2658_v33, %v552_v40 }
 0x6fe   :  { %v756_v34 = vpop.permute.xlu1 %755 }
 0x6ff   :  { %v758_v35 = vmul.f32 %v2658_v33, %v756_v34 }
 0x701   :  { %760 = vrot.lane.b32.xlu0 %v758_v35, %s2866_s4 }
 0x705   :  { %782 = vperm.xlu0 %2636, %v779_v36  }
 0x70b   :  { %v776_v48 = vpop.permute.xlu1 %775 }
 0x773   :  { %v761_v42 = vpop.permute.xlu0 %760 }
 0x774   :  { %v763_v43 = vadd.f32 %v761_v42, %v753_v41 }
 0x776   :  { %2659 = vtanh.f32 %v763_v43 }
 0x780   :  { %v783_v49 = vpop.permute.xlu0 %782 }
 0x781   :  { %v788_v52 = vmul.f32 %v783_v49, %v555_v20  ;;  %v785_v18 = vmul.f32 %v783_v49, %v552_v40  ;;  %v778_v20 = vmul.f32 %v776_v48, %v763_v43 }
 0x783   :  { %v2660_v47 = vpop.eup %2659  ;;  %v786_v21 = vadd.f32 %v785_v18, %v778_v20 }
 0x784   :  { %766 = vrot.lane.b32.xlu1 %v2660_v47, %s2865_s1 }
 0x7f6   :  { %v767_v50 = vpop.permute.xlu1 %766 }
 0x7f7   :  { %v769_v51 = vmul.f32 %v2658_v33, %v767_v50 }
 0x7f9   :  { %v3116_v53 = vmul.f32 %v776_v48, %v769_v51 }
 0x7fb   :  { %v789_v54 = vadd.f32 %v788_v52, %v3116_v53  ;;  %v1247_v52 = vsub.f32 1.0, %v2344_v45 }
 0x7fd   :  { %830 = vrot.lane.b32.xlu0 %v789_v54, %s2866_s4 }
 0x86f   :  { %v831_v57 = vpop.permute.xlu0 %830 }
 0x870   :  { %2506 = vmatmul.mubr.msk.f32.vlgmr.msra.gmra.mxu1 %vm120_vm4, %v831_v57 }
 0x871   :  { %2527 = vmatpush3.msra.mxu1 %v2975_v3  ;;  %2530 = vmatprep.mubr.msk.f32.mxu1 %vm2863_vm0, %v2862_v0 }
 0x872   :  { %2528 = vmatprep.subr.mxu1 %v2862_v0 }
 0x873   :  { %2529 = vmatpush3.msra.mxu1 %v2979_v4 }
 0x874   :  { %2533 = vmatprep.subr.mxu1 %v2862_v0  ;;  %2531 = vmatmul.mubr.msk.f32.vlgmr.msra.gmra.mxu1 %vm199_vm2, %v1140_v27  ;;  %v2348_v27 = vsel %vm1472_vm9, 1.0, %v2862_v0 }
 0x875   :  { %2534 = vmatpush3.msra.mxu1 %v2971_v1  ;;  %2541 = vmatprep.mubr.msk.f32.mxu1 %vm2863_vm0, %v2862_v0 }
 0x876   :  { %2535 = vmatprep.subr.mxu1 %v2862_v0 }
 0x877   :  { %2536 = vmatpush3.msra.mxu1 %v2973_v2 }
 0x878   :  { %2537 = vmatprep.subr.mxu1 %v2862_v0 }
 0x879   :  { %2538 = vmatpush3.msra.mxu1 %v2983_v5 }
 0x87a   :  { %2539 = vmatprep.subr.mxu1 %v2862_v0 }
 0x87b   :  { %2540 = vmatpush3.msra.mxu1 %v2993_v9 }
 0x87c   :  { %2562 = vmatprep.subr.mxu1 %v2862_v0 }
 0x930   :  { %v900_v58 = vpop.f32.mrf.mxu1 }
 0x931   :  { %v976_v59 = vadd.f32 %v975_v55, %v900_v58 }
 0x932   :  { %v2507_v60 = vpop.f32.mrf.mxu1 }
 0x933   :  { %v979_v61 = vadd.f32 %v3034_v16, %v976_v59  ;;  %v1372_v60 = vrot.slane %v2985_v6, 5 }
 0x934   :  { %v1209_v36 = vpop.f32.mrf.mxu1 }
 0x935   :  { %2661 = vtanh.f32 %v979_v61  ;;  %v2339_v8 = vmul.f32 -1.442695, %v979_v61  ;;  %v1373_v61 = vrot.slane %v2987_v7, 4 }
 0x936   :  { %v2532_v37 = vpop.f32.mrf.mxu1 }
 0x937   :  { %2663 = vpow2.f32 %v2339_v8 }
 0x942   :  { %v2662_v62 = vpop.eup %2661 }
 0x943   :  { %989 = vrot.lane.b32.xlu1 %v2662_v62, %s2865_s1  ;;  %v1374_v62 = vsel %vm197_vm1, %v1373_v61, %v1372_v60 }
 0x944   :  { %v2664_v10 = vpop.eup %2663 }
 0x945   :  { %v983_v12 = vadd.f32 1.0, %v2664_v10 }
 0x947   :  { %1009 = vperm.xlu1 %2635, %v2340_v63   ;;  %2665 = vrcp.f32 %v983_v12 }
 0x954   :  { %v2666_v13 = vpop.eup %2665 }
 0x955   :  { %v987_v22 = vmul.f32 %v2666_v13, %v786_v21 }
 0x9b5   :  { %v990_v14 = vpop.permute.xlu1 %989 }
 0x9b6   :  { %v992_v15 = vmul.f32 %v2666_v13, %v990_v14 }
 0x9b8   :  { %994 = vrot.lane.b32.xlu0 %v992_v15, %s2866_s4 }
 0x9bc   :  { %1016 = vperm.xlu0 %2636, %v1013_v17  }
 0x9c2   :  { %v1010_v29 = vpop.permute.xlu1 %1009 }
 0xa2a   :  { %v995_v23 = vpop.permute.xlu0 %994 }
 0xa2b   :  { %v997_v24 = vadd.f32 %v995_v23, %v987_v22 }
 0xa2d   :  { %2667 = vtanh.f32 %v997_v24  ;;  %v1012_v55 = vmul.f32 %v1010_v29, %v997_v24 }
 0xa37   :  { %v1017_v30 = vpop.permute.xlu0 %1016 }
 0xa38   :  { %v1022_v33 = vmul.f32 %v1017_v30, %v789_v54  ;;  %v1019_v54 = vmul.f32 %v1017_v30, %v786_v21 }
 0xa3a   :  { %v2668_v28 = vpop.eup %2667  ;;  %v1020_v56 = vadd.f32 %v1019_v54, %v1012_v55 }
 0xa3b   :  { %1000 = vrot.lane.b32.xlu1 %v2668_v28, %s2865_s1 }
 0xaad   :  { %v1001_v31 = vpop.permute.xlu1 %1000 }
 0xaae   :  { %v1003_v32 = vmul.f32 %v2666_v13, %v1001_v31 }
 0xab0   :  { %v3147_v34 = vmul.f32 %v1010_v29, %v1003_v32 }
 0xab2   :  { %v1023_v35 = vadd.f32 %v1022_v33, %v3147_v34 }
 0xab4   :  { %1064 = vrot.lane.b32.xlu0 %v1023_v35, %s2866_s4 }
 0xb26   :  { %v1065_v39 = vpop.permute.xlu0 %1064 }
 0xb27   :  { %2524 = vmatmul.mubr.msk.f32.vlgmr.msra.gmra.mxu0 %vm120_vm4, %v1065_v39 }
 0xb28   :  { %2545 = vmatpush3.msra.mxu0 %v2975_v3  ;;  %2548 = vmatprep.mubr.msk.f32.mxu0 %vm2863_vm0, %v2862_v0 }
 0xb29   :  { %2546 = vmatprep.subr.mxu0 %v2862_v0 }
 0xb2a   :  { %2547 = vmatpush3.msra.mxu0 %v2979_v4 }
 0xb2b   :  { %2551 = vmatprep.subr.mxu0 %v2862_v0  ;;  %2549 = vmatmul.mubr.msk.f32.vlgmr.msra.gmra.mxu0 %vm199_vm2, %v1374_v62 }
 0xb2c   :  { %2552 = vmatpush3.msra.mxu0 %v2971_v1  ;;  %2559 = vmatprep.mubr.msk.f32.mxu0 %vm2863_vm0, %v2862_v0 }
 0xb2d   :  { %2553 = vmatprep.subr.mxu0 %v2862_v0 }
 0xb2e   :  { %2554 = vmatpush3.msra.mxu0 %v2973_v2 }
 0xb2f   :  { %2555 = vmatprep.subr.mxu0 %v2862_v0 }
 0xb30   :  { %2556 = vmatpush3.msra.mxu0 %v2983_v5 }
 0xb31   :  { %2557 = vmatprep.subr.mxu0 %v2862_v0 }
 0xb32   :  { %2558 = vmatpush3.msra.mxu0 %v2993_v9 }
 0xb33   :  { %2580 = vmatprep.subr.mxu0 %v2862_v0 }
 0xbe7   :  { %v1134_v40 = vpop.f32.mrf.mxu0 }
 0xbe8   :  { %v1210_v41 = vadd.f32 %v1209_v36, %v1134_v40 }
 0xbe9   :  { %v2525_v42 = vpop.f32.mrf.mxu0 }
 0xbea   :  { %v1213_v43 = vadd.f32 %v3034_v16, %v1210_v41 }
 0xbeb   :  { %v1443_v18 = vpop.f32.mrf.mxu0 }
 0xbec   :  { %2669 = vtanh.f32 %v1213_v43  ;;  %v2343_v46 = vmul.f32 -1.442695, %v1213_v43  ;;  %v1606_v43 = vrot.slane %v2985_v6, 6 }
 0xbed   :  { %v2550_v20 = vpop.f32.mrf.mxu0 }
 0xbee   :  { %2671 = vpow2.f32 %v2343_v46  ;;  %v1840_v20 = vrot.slane %v2985_v6, 7 }
 0xbf9   :  { %v2670_v44 = vpop.eup %2669 }
 0xbfa   :  { %1223 = vrot.lane.b32.xlu1 %v2670_v44, %s2865_s1  ;;  %v1607_v44 = vrot.slane %v2987_v7, 5 }
 0xbfb   :  { %v2672_v47 = vpop.eup %2671 }
 0xbfc   :  { %v1217_v48 = vadd.f32 1.0, %v2672_v47 }
 0xbfe   :  { %1243 = vperm.xlu1 %2635, %v2344_v45   ;;  %2673 = vrcp.f32 %v1217_v48  ;;  %v1608_v45 = vsel %vm197_vm1, %v1607_v44, %v1606_v43 }
 0xc0b   :  { %v2674_v49 = vpop.eup %2673 }
 0xc0c   :  { %v1221_v57 = vmul.f32 %v2674_v49, %v1020_v56 }
 0xc6c   :  { %v1224_v50 = vpop.permute.xlu1 %1223 }
 0xc6d   :  { %v1226_v51 = vmul.f32 %v2674_v49, %v1224_v50 }
 0xc6f   :  { %1228 = vrot.lane.b32.xlu0 %v1226_v51, %s2866_s4 }
 0xc73   :  { %1250 = vperm.xlu0 %2636, %v1247_v52  }
 0xc79   :  { %v1244_v8 = vpop.permute.xlu1 %1243 }
 0xce1   :  { %v1229_v58 = vpop.permute.xlu0 %1228 }
 0xce2   :  { %v1231_v59 = vadd.f32 %v1229_v58, %v1221_v57 }
 0xce4   :  { %2675 = vtanh.f32 %v1231_v59  ;;  %v1246_v37 = vmul.f32 %v1244_v8, %v1231_v59 }
 0xcee   :  { %v1251_v10 = vpop.permute.xlu0 %1250 }
 0xcef   :  { %v1256_v14 = vmul.f32 %v1251_v10, %v1023_v35  ;;  %v1481_v35 = vsub.f32 1.0, %v2348_v27  ;;  %v1253_v36 = vmul.f32 %v1251_v10, %v1020_v56 }
 0xcf1   :  { %v2676_v63 = vpop.eup %2675  ;;  %v1254_v39 = vadd.f32 %v1253_v36, %v1246_v37  ;;  %v2867_v37 = vmov 1966171168  }
 0xcf2   :  { %1234 = vrot.lane.b32.xlu1 %v2676_v63, %s2865_s1 }
 0xd64   :  { %v1235_v12 = vpop.permute.xlu1 %1234 }
 0xd65   :  { %v1237_v13 = vmul.f32 %v2674_v49, %v1235_v12 }
 0xd67   :  { %v3178_v15 = vmul.f32 %v1244_v8, %v1237_v13 }
 0xd69   :  { %v1257_v17 = vadd.f32 %v1256_v14, %v3178_v15 }
 0xd6b   :  { %1298 = vrot.lane.b32.xlu0 %v1257_v17, %s2866_s4 }
 0xddd   :  { %v1299_v21 = vpop.permute.xlu0 %1298 }
 0xdde   :  { %2542 = vmatmul.mubr.msk.f32.vlgmr.msra.gmra.mxu1 %vm120_vm4, %v1299_v21  ;;  %v1841_v21 = vrot.slane %v2987_v7, 6 }
 0xddf   :  { %2563 = vmatpush3.msra.mxu1 %v2975_v3  ;;  %2566 = vmatprep.mubr.msk.f32.mxu1 %vm2863_vm0, %v2862_v0 }
 0xde0   :  { %2564 = vmatprep.subr.mxu1 %v2862_v0 }
 0xde1   :  { %2565 = vmatpush3.msra.mxu1 %v2979_v4 }
 0xde2   :  { %2569 = vmatprep.subr.mxu1 %v2862_v0  ;;  %2567 = vmatmul.mubr.msk.f32.vlgmr.msra.gmra.mxu1 %vm199_vm2, %v1608_v45 }
 0xde3   :  { %2570 = vmatpush3.msra.mxu1 %v2971_v1  ;;  %2577 = vmatprep.mubr.msk.f32.mxu1 %vm2863_vm0, %v2862_v0 }
 0xde4   :  { %2571 = vmatprep.subr.mxu1 %v2862_v0 }
 0xde5   :  { %2572 = vmatpush3.msra.mxu1 %v2973_v2 }
 0xde6   :  { %2573 = vmatprep.subr.mxu1 %v2862_v0 }
 0xde7   :  { %2574 = vmatpush3.msra.mxu1 %v2983_v5 }
 0xde8   :  { %2575 = vmatprep.subr.mxu1 %v2862_v0 }
 0xde9   :  { %2576 = vmatpush3.msra.mxu1 %v2993_v9 }
 0xdea   :  { %2598 = vmatprep.subr.mxu1 %v2862_v0 }
 0xe9e   :  { %v1368_v22 = vpop.f32.mrf.mxu1 }
 0xe9f   :  { %v1444_v23 = vadd.f32 %v1443_v18, %v1368_v22  ;;  %v1842_v22 = vsel %vm197_vm1, %v1841_v21, %v1840_v20 }
 0xea0   :  { %v2543_v24 = vpop.f32.mrf.mxu1 }
 0xea1   :  { %v1447_v25 = vadd.f32 %v3034_v16, %v1444_v23 }
 0xea2   :  { %v1677_v52 = vpop.f32.mrf.mxu1 }
 0xea3   :  { %2677 = vtanh.f32 %v1447_v25  ;;  %v2347_v28 = vmul.f32 -1.442695, %v1447_v25 }
 0xea4   :  { %v2568_v54 = vpop.f32.mrf.mxu1 }
 0xea5   :  { %2679 = vpow2.f32 %v2347_v28 }
 0xeb0   :  { %v2678_v26 = vpop.eup %2677 }
 0xeb1   :  { %1457 = vrot.lane.b32.xlu1 %v2678_v26, %s2865_s1 }
 0xeb2   :  { %v2680_v29 = vpop.eup %2679 }
 0xeb3   :  { %v1451_v30 = vadd.f32 1.0, %v2680_v29 }
 0xeb5   :  { %1477 = vperm.xlu1 %2635, %v2348_v27   ;;  %2681 = vrcp.f32 %v1451_v30 }
 0xec2   :  { %v2682_v31 = vpop.eup %2681 }
 0xec3   :  { %v1455_v40 = vmul.f32 %v2682_v31, %v1254_v39 }
 0xf23   :  { %v1458_v32 = vpop.permute.xlu1 %1457 }
 0xf24   :  { %v1460_v33 = vmul.f32 %v2682_v31, %v1458_v32 }
 0xf26   :  { %1462 = vrot.lane.b32.xlu0 %v1460_v33, %s2866_s4 }
 0xf2a   :  { %1484 = vperm.xlu0 %2636, %v1481_v35  }
 0xf30   :  { %v1478_v1 = vpop.permute.xlu1 %1477 }
 0xf98   :  { %v1463_v41 = vpop.permute.xlu0 %1462 }
 0xf99   :  { %v1465_v42 = vadd.f32 %v1463_v41, %v1455_v40  ;;  %v326_v40 = vlaneseq }
 0xf9b   :  { %2683 = vtanh.f32 %v1465_v42  ;;  %v1480_v12 = vmul.f32 %v1478_v1, %v1465_v42  ;;  %v327_v42 = vshrl.u32 %v326_v40, 7 }
 0xfa5   :  { %v1485_v47 = vpop.permute.xlu0 %1484 }
 0xfa6   :  { %v1490_v50 = vmul.f32 %v1485_v47, %v1257_v17  ;;  %v1487_v10 = vmul.f32 %v1485_v47, %v1254_v39  ;;  %v324_v39 = vunpack.c.l.s4 %v2867_v37  ;;  %v3264_v47 = vsub.s32 0, %v327_v42 }
 0xfa8   :  { %v2684_v46 = vpop.eup %2683  ;;  %v3225_v13 = vadd.f32 %v1487_v10, %v1480_v12  ;;  %v325_v41 = vunpack.c.0.s8 %v324_v39 }
 0xfa9   :  { %1468 = vrot.lane.b32.xlu1 %v2684_v46, %s2865_s1  ;;  %v3259_v46 = vsel %vm1940_vm11, 1.0, %v2862_v0 }
 0xfaa   :  { %v3252_v43 = vsub.s32 %v325_v41, %v327_v42 }
 0xfac   :  { %v329_v44 = vrot.slane %v3040_v38, %v3252_v43  ;;  %v1265_v38 = vrot.slane %v3178_v15, %v3252_v43  ;;  %v1031_v37 = vrot.slane %v3147_v34, %v3252_v43 }
 0xfae   :  { %v1032_v34 = vcombine.high %v1031_v37, %v1031_v37 }
0x101b   :  { %v1469_v48 = vpop.permute.xlu1 %1468 }
0x101c   :  { %v1471_v49 = vmul.f32 %v2682_v31, %v1469_v48 }
0x101e   :  { %v3209_v51 = vmul.f32 %v1478_v1, %v1471_v49  ;;  %v337_v1 = vrot.slane %v329_v44, %v3252_v43 }
0x1020   :  { %v1491_v2 = vadd.f32 %v1490_v50, %v3209_v51  ;;  %v348_v11 = vrot.slane %v337_v1, %v3264_v47 }
0x1022   :  { %1532 = vrot.lane.b32.xlu0 %v1491_v2, %s2866_s4 }
0x1094   :  { %v1533_v5 = vpop.permute.xlu0 %1532 }
0x1095   :  { %2560 = vmatmul.mubr.msk.f32.vlgmr.msra.gmra.mxu0 %vm120_vm4, %v1533_v5 }
0x1096   :  { %2581 = vmatpush3.msra.mxu0 %v2975_v3  ;;  %2584 = vmatprep.mubr.msk.f32.mxu0 %vm2863_vm0, %v2862_v0  ;;  %v2352_v3 = vsel %vm1706_vm10, 1.0, %v2862_v0 }
0x1097   :  { %2582 = vmatprep.subr.mxu0 %v2862_v0  ;;  %v1715_v8 = vsub.f32 1.0, %v2352_v3 }
0x1098   :  { %2583 = vmatpush3.msra.mxu0 %v2979_v4 }
0x1099   :  { %2587 = vmatprep.subr.mxu0 %v2862_v0  ;;  %2585 = vmatmul.mubr.msk.f32.vlgmr.msra.gmra.mxu0 %vm199_vm2, %v1842_v22 }
0x109a   :  { %2595 = vmatprep.mubr.msk.f32.mxu0 %vm2863_vm0, %v2862_v0 }
0x1155   :  { %v1602_v9 = vpop.f32.mrf.mxu0 }
0x1156   :  { %v1678_v55 = vadd.f32 %v1677_v52, %v1602_v9 }
0x1157   :  { %v2561_v56 = vpop.f32.mrf.mxu0 }
0x1158   :  { %v1681_v57 = vadd.f32 %v3034_v16, %v1678_v55  ;;  %v1266_v55 = vcombine.high %v1265_v38, %v1265_v38 }
0x1159   :  { %v1911_v29 = vpop.f32.mrf.mxu0 }
0x115a   :  { %2685 = vtanh.f32 %v1681_v57  ;;  %v2351_v59 = vmul.f32 -1.442695, %v1681_v57 }
0x115b   :  { %v2586_v30 = vpop.f32.mrf.mxu0 }
0x115c   :  { %2687 = vpow2.f32 %v2351_v59  ;;  %v1280_v59 = vrot.slane %v1266_v55, %v3252_v43 }
0x1167   :  { %v2686_v58 = vpop.eup %2685 }
0x1168   :  { %1691 = vrot.lane.b32.xlu1 %v2686_v58, %s2865_s1 }
0x1169   :  { %v2688_v60 = vpop.eup %2687 }
0x116a   :  { %v1685_v4 = vadd.f32 1.0, %v2688_v60  ;;  %v1288_v60 = vrot.slane %v1280_v59, %v3264_v47 }
0x116c   :  { %1711 = vperm.xlu1 %2635, %v2352_v3   ;;  %2689 = vrcp.f32 %v1685_v4 }
0x1179   :  { %v2690_v61 = vpop.eup %2689 }
0x117a   :  { %v1689_v14 = vmul.f32 %v2690_v61, %v3225_v13 }
0x11da   :  { %v1692_v62 = vpop.permute.xlu1 %1691 }
0x11db   :  { %v1694_v63 = vmul.f32 %v2690_v61, %v1692_v62 }
0x11dd   :  { %1696 = vrot.lane.b32.xlu0 %v1694_v63, %s2866_s4 }
0x11e1   :  { %1718 = vperm.xlu0 %2636, %v1715_v8  }
0x11e7   :  { %v3238_v24 = vpop.permute.xlu1 %1711 }
0x124f   :  { %v1697_v17 = vpop.permute.xlu0 %1696 }
0x1250   :  { %v3228_v18 = vadd.f32 %v1697_v17, %v1689_v14 }
0x1252   :  { %2691 = vtanh.f32 %v3228_v18  ;;  %v1714_v30 = vmul.f32 %v3238_v24, %v3228_v18 }
0x125c   :  { %v3240_v25 = vpop.permute.xlu0 %1718 }
0x125d   :  { %v1724_v6 = vmul.f32 %v3240_v25, %v1491_v2  ;;  %v330_v2 = vcombine.high %v329_v44, %v329_v44 }
0x125f   :  { %v2692_v23 = vpop.eup %2691  ;;  %v344_v9 = vrot.slane %v330_v2, %v3252_v43 }
0x1260   :  { %1702 = vrot.lane.b32.xlu1 %v2692_v23, %s2865_s1 }
0x1261   :  { %v352_v56 = vrot.slane %v344_v9, %v3264_v47 }
0x12d2   :  { %v1703_v26 = vpop.permute.xlu1 %1702 }
0x12d3   :  { %v1705_v27 = vmul.f32 %v2690_v61, %v1703_v26 }
0x12d5   :  { %v1723_v7 = vmul.f32 %v3238_v24, %v1705_v27  ;;  %v1039_v24 = vrot.slane %v1031_v37, %v3252_v43 }
0x12d7   :  { %v3244_v28 = vadd.f32 %v1724_v6, %v1723_v7  ;;  %v1733_v49 = vrot.slane %v1723_v7, %v3252_v43 }
0x12d9   :  { %1766 = vrot.lane.b32.xlu0 %v3244_v28, %s2866_s4  ;;  %v1741_v54 = vrot.slane %v1733_v49, %v3252_v43  ;;  %v1734_v58 = vcombine.high %v1733_v49, %v1733_v49 }
0x12db   :  { %v1752_v5 = vrot.slane %v1741_v54, %v3264_v47  ;;  %v1748_v4 = vrot.slane %v1734_v58, %v3252_v43 }
0x12dd   :  { %v1756_v61 = vrot.slane %v1748_v4, %v3264_v47 }
0x134b   :  { %v1767_v31 = vpop.permute.xlu0 %1766 }
0x134c   :  { %2578 = vmatmul.mubr.msk.f32.vlgmr.msra.gmra.mxu1 %vm120_vm4, %v1767_v31 }
0x134d   :  { %2606 = vmatprep.mubr.msk.f32.mxu1 %vm2863_vm0, %v2862_v0 }
0x140c   :  { %v1836_v32 = vpop.f32.mrf.mxu1 }
0x140d   :  { %v1912_v33 = vadd.f32 %v1911_v29, %v1836_v32  ;;  %v1721_v29 = vmul.f32 %v3240_v25, %v3225_v13  ;;  %v1499_v13 = vrot.slane %v3209_v51, %v3252_v43 }
0x140e   :  { %v2579_v35 = vpop.f32.mrf.mxu1 }
0x140f   :  { %v1915_v36 = vadd.f32 %v3034_v16, %v1912_v33  ;;  %v797_v16 = vrot.slane %v3116_v53, %v3252_v43  ;;  %v1273_v53 = vrot.slane %v1265_v38, %v3252_v43  ;;  %v1722_v31 = vadd.f32 %v1721_v29, %v1714_v30  ;;  %v2044_v29 = vld [vmem:[#allocation9 + $0x8] sm:$0xff] }
0x1410   :  { %v1507_v41 = vrot.slane %v1499_v13, %v3252_v43  ;;  %v1500_v49 = vcombine.high %v1499_v13, %v1499_v13  ;;  %v2358_v13 = vld [vmem:[%s3397_s6] ss:$0 sm:$0xff] }
0x1411   :  { %2693 = vtanh.f32 %v1915_v36  ;;  %v805_v48 = vrot.slane %v797_v16, %v3252_v43  ;;  %v1284_v52 = vrot.slane %v1273_v53, %v3264_v47  ;;  %v798_v15 = vcombine.high %v797_v16, %v797_v16 }
0x1412   :  { %v2355_v62 = vmul.f32 -1.442695, %v1915_v36  ;;  %v563_v36 = vrot.slane %v3085_v19, %v3252_v43  ;;  %v1050_v19 = vrot.slane %v1039_v24, %v3264_v47  ;;  %v1518_v42 = vrot.slane %v1507_v41, %v3264_v47 }
0x1413   :  { %v816_v50 = vrot.slane %v805_v48, %v3264_v47  ;;  %v812_v57 = vrot.slane %v798_v15, %v3252_v43  ;;  %v1514_v15 = vrot.slane %v1500_v49, %v3252_v43 }
0x1414   :  { %2695 = vpow2.f32 %v2355_v62  ;;  %v571_v39 = vrot.slane %v563_v36, %v3252_v43  ;;  %v564_v25 = vcombine.high %v563_v36, %v563_v36  ;;  %v1949_v62 = vsub.f32 1.0, %v3259_v46 }
0x1415   :  { %v820_v3 = vrot.slane %v812_v57, %v3264_v47  ;;  %v1522_v9 = vrot.slane %v1514_v15, %v3264_v47 }
0x1416   :  { %v582_v18 = vrot.slane %v571_v39, %v3264_v47  ;;  %v578_v44 = vrot.slane %v564_v25, %v3252_v43  ;;  %v2357_v39 = vld [vmem:[%s3396_s5] ss:$0 sm:$0xff]  ;;  %v2207_v25 = vld [vmem:[#allocation11 + $0x18] sm:$0xff] }
0x1418   :  { %v586_v51 = vrot.slane %v578_v44, %v3264_v47  ;;  %v2204_v44 = vld [vmem:[#allocation11] sm:$0xff] }
0x141e   :  { %v2694_v45 = vpop.eup %2693 }
0x141f   :  { %1925 = vrot.lane.b32.xlu1 %v2694_v45, %s2865_s1  ;;  %v1046_v45 = vrot.slane %v1032_v34, %v3252_v43 }
0x1421   :  { %v2696_v63 = vpop.eup %2695  ;;  %v1054_v16 = vrot.slane %v1046_v45, %v3264_v47 }
0x1422   :  { %v1919_v8 = vadd.f32 1.0, %v2696_v63 }
0x1423   :  { %1945 = vperm.xlu1 %2635, %v3259_v46   ;;  %v2046_v46 = vld [vmem:[#allocation9 + $0x18] sm:$0xff] }
0x1424   :  { %2697 = vrcp.f32 %v1919_v8  ;;  %2588 = vmatpush3.msra.mxu0 %v2046_v46  ;;  %2599 = vmatpush3.msra.mxu1 %v2046_v46 }
0x1425   :  { %2589 = vmatprep.subr.mxu0 %v2862_v0  ;;  %2600 = vmatprep.subr.mxu1 %v2862_v0 }
0x1427   :  { %353 = vrot.lane.b32.xlu1 %v348_v11, %s2866_s4 }
0x142b   :  { %821 = vrot.lane.b32.xlu1 %v816_v50, %s2866_s4 }
0x142f   :  { %1289 = vrot.lane.b32.xlu1 %v1284_v52, %s2866_s4 }
0x1431   :  { %v2698_v10 = vpop.eup %2697 }
0x1432   :  { %v1923_v32 = vmul.f32 %v2698_v10, %v1722_v31 }
0x1433   :  { %1757 = vrot.lane.b32.xlu1 %v1752_v5, %s2866_s4 }
0x1437   :  { %355 = vrot.lane.b32.xlu1 %v352_v56, %s2866_s4 }
0x143b   :  { %823 = vrot.lane.b32.xlu1 %v820_v3, %s2866_s4 }
0x143f   :  { %1291 = vrot.lane.b32.xlu1 %v1288_v60, %s2866_s4 }
0x1443   :  { %1759 = vrot.lane.b32.xlu1 %v1756_v61, %s2866_s4 }
0x1491   :  { %v1926_v12 = vpop.permute.xlu1 %1925 }
0x1492   :  { %v1928_v14 = vmul.f32 %v2698_v10, %v1926_v12 }
0x1494   :  { %1930 = vrot.lane.b32.xlu0 %v1928_v14, %s2866_s4 }
0x149e   :  { %v1946_v17 = vpop.permute.xlu1 %1945 }
0x14a2   :  { %v354_v20 = vpop.permute.xlu1 %353 }
0x14a3   :  { %360 = vst.msk [vmem:[#allocation2] sm:$0x1] %vm359_vm12, %v354_v20 }
0x14a6   :  { %v822_v21 = vpop.permute.xlu1 %821 }
0x14a7   :  { %827 = vst.msk [vmem:[#allocation2 + $0x2] sm:$0x1] %vm359_vm12, %v822_v21 }
0x14aa   :  { %v1290_v22 = vpop.permute.xlu1 %1289 }
0x14ab   :  { %1295 = vst.msk [vmem:[#allocation2 + $0x4] sm:$0x1] %vm359_vm12, %v1290_v22 }
0x14ae   :  { %v1758_v23 = vpop.permute.xlu1 %1757 }
0x14af   :  { %1763 = vst.msk [vmem:[#allocation2 + $0x6] sm:$0x1] %vm359_vm12, %v1758_v23 }
0x14b2   :  { %v356_v26 = vpop.permute.xlu1 %355 }
0x14b3   :  { %361 = vst.msk [vmem:[#allocation2 + $0x8] sm:$0x1] %vm359_vm12, %v356_v26 }
0x14b6   :  { %v824_v27 = vpop.permute.xlu1 %823 }
0x14b7   :  { %828 = vst.msk [vmem:[#allocation2 + $0xa] sm:$0x1] %vm359_vm12, %v824_v27 }
0x14ba   :  { %v1292_v6 = vpop.permute.xlu1 %1291 }
0x14bb   :  { %1296 = vst.msk [vmem:[#allocation2 + $0xc] sm:$0x1] %vm359_vm12, %v1292_v6 }
0x14be   :  { %v1760_v7 = vpop.permute.xlu1 %1759 }
0x14bf   :  { %1764 = vst.msk [vmem:[#allocation2 + $0xe] sm:$0x1] %vm359_vm12, %v1760_v7  ;;  %v2045_v7 = vld [vmem:[#allocation9 + $0x10] sm:$0xff] }
0x14c0   :  { %2590 = vmatpush3.msra.mxu0 %v2045_v7  ;;  %2601 = vmatpush3.msra.mxu1 %v2045_v7 }
0x14c1   :  { %2591 = vmatprep.subr.mxu0 %v2862_v0  ;;  %2602 = vmatprep.subr.mxu1 %v2862_v0 }
0x14c2   :  { %2592 = vmatpush3.msra.mxu0 %v2044_v29  ;;  %2603 = vmatpush3.msra.mxu1 %v2044_v29 }
0x14c3   :  { %2593 = vmatprep.subr.mxu0 %v2862_v0  ;;  %2604 = vmatprep.subr.mxu1 %v2862_v0 }
0x1506   :  { %v1931_v33 = vpop.permute.xlu0 %1930 }
0x1507   :  { %v1933_v35 = vadd.f32 %v1931_v33, %v1923_v32 }
0x1509   :  { %2699 = vtanh.f32 %v1933_v35 }
0x1516   :  { %v2700_v40 = vpop.eup %2699 }
0x1517   :  { %1936 = vrot.lane.b32.xlu0 %v2700_v40, %s2865_s1 }
0x151b   :  { %587 = vrot.lane.b32.xlu0 %v582_v18, %s2866_s4 }
0x151f   :  { %1055 = vrot.lane.b32.xlu0 %v1050_v19, %s2866_s4  ;;  %v2206_v19 = vld [vmem:[#allocation11 + $0x10] sm:$0xff] }
0x1523   :  { %1523 = vrot.lane.b32.xlu0 %v1518_v42, %s2866_s4  ;;  %v2205_v42 = vld [vmem:[#allocation11 + $0x8] sm:$0xff] }
0x1527   :  { %589 = vrot.lane.b32.xlu0 %v586_v51, %s2866_s4 }
0x152b   :  { %1057 = vrot.lane.b32.xlu0 %v1054_v16, %s2866_s4 }
0x1589   :  { %v1937_v1 = vpop.permute.xlu0 %1936 }
0x158a   :  { %v1939_v38 = vmul.f32 %v2698_v10, %v1937_v1  ;;  %v2359_v1 = vld [vmem:[%s3399_s8] ss:$0 sm:$0xff]  ;;  %s2805_s8 = scalar_lea.vmem %s2298_s19, 256 }
0x158b   :  { %p2806_p11 = scmp.ne.s32.totalorder %s2298_s19, %s2805_s8  ;;  %p2811_p13 = scmp.lt.s32.totalorder %s2805_s8, %s2805_s8 }
0x158c   :  { %v1948_v11 = vmul.f32 %v1946_v17, %v1939_v38 }
0x158d   :  { %v588_v48 = vpop.permute.xlu0 %587  ;;  %p2812_p0 = por %p2811_p13, %p2810_p12 }
0x158e   :  { %v1964_v50 = vrot.slane %v1948_v11, %v3252_v43  ;;  %593 = vst.msk [vmem:[#allocation2 + $0x1] sm:$0x1] %vm359_vm12, %v588_v48 }
0x158f   :  { %p2813_p1 = pnand %p2812_p0, %p2806_p11 }
0x1590   :  { %v1972_v53 = vrot.slane %v1964_v50, %v3252_v43  ;;  %v1965_v52 = vcombine.high %v1964_v50, %v1964_v50 }
0x1591   :  { %v1056_v2 = vpop.permute.xlu0 %1055 }
0x1592   :  { %1061 = vst.msk [vmem:[#allocation2 + $0x3] sm:$0x1] %vm359_vm12, %v1056_v2  ;;  %v1983_v54 = vrot.slane %v1972_v53, %v3264_v47  ;;  %v1979_v55 = vrot.slane %v1965_v52, %v3252_v43 }
0x1594   :  { %1988 = vrot.lane.b32.xlu0 %v1983_v54, %s2866_s4  ;;  %v1987_v57 = vrot.slane %v1979_v55, %v3264_v47 }
0x1595   :  { %v1524_v5 = vpop.permute.xlu0 %1523 }
0x1596   :  { %1529 = vst.msk [vmem:[#allocation2 + $0x5] sm:$0x1] %vm359_vm12, %v1524_v5 }
0x1598   :  { %1525 = vrot.lane.b32.xlu0 %v1522_v9, %s2866_s4 }
0x1599   :  { %v590_v56 = vpop.permute.xlu0 %589 }
0x159a   :  { %594 = vst.msk [vmem:[#allocation2 + $0x9] sm:$0x1] %vm359_vm12, %v590_v56 }
0x159c   :  { %1990 = vrot.lane.b32.xlu0 %v1987_v57, %s2866_s4 }
0x159d   :  { %v1058_v58 = vpop.permute.xlu0 %1057 }
0x159e   :  { %1062 = vst.msk [vmem:[#allocation2 + $0xb] sm:$0x1] %vm359_vm12, %v1058_v58 }
0x1606   :  { %v1989_v3 = vpop.permute.xlu0 %1988 }
0x1607   :  { %1994 = vst.msk [vmem:[#allocation2 + $0x7] sm:$0x1] %vm359_vm12, %v1989_v3 }
0x160a   :  { %v1526_v59 = vpop.permute.xlu0 %1525 }
0x160b   :  { %1530 = vst.msk [vmem:[#allocation2 + $0xd] sm:$0x1] %vm359_vm12, %v1526_v59 }
0x160e   :  { %v1991_v60 = vpop.permute.xlu0 %1990  ;;  %v1996_v43 = vld [vmem:[#allocation2] sm:$0xff] }
0x160f   :  { %1995 = vst.msk [vmem:[#allocation2 + $0xf] sm:$0x1] %vm359_vm12, %v1991_v60  ;;  %v1998_v4 = vsel %vm120_vm4, %v1996_v43, 0.0 }
0x1610   :  { %1999 = vadd.xlane.f32.xlu1 %v1998_v4 }
0x1616   :  { %v1997_v61 = vld [vmem:[#allocation2 + $0x8] sm:$0xff] }
0x1617   :  { %v2001_v47 = vsel %vm120_vm4, %v1997_v61, 0.0 }
0x1618   :  { %2002 = vadd.xlane.f32.xlu0 %v2001_v47 }
0x162e   :  { %1952 = vperm.xlu0 %2636, %v1949_v62  }
0x1699   :  { %v2000_v63 = vpop.xlane.xlu1 %1999 }
0x169a   :  { %v2005_v8 = vmul.f32 0.03125, %v2000_v63 }
0x169c   :  { %v2007_v10 = vsub.f32 %v1996_v43, %v2005_v8 }
0x169e   :  { %v2009_v12 = vmul.f32 %v2007_v10, %v2007_v10 }
0x16a0   :  { %v2011_v14 = vsel %vm120_vm4, %v2009_v12, 0.0 }
0x16a1   :  { %2012 = vadd.xlane.f32.xlu1 %v2011_v14  ;;  %v2003_v17 = vpop.xlane.xlu0 %2002 }
0x16a2   :  { %v2006_v20 = vmul.f32 0.03125, %v2003_v17 }
0x16a4   :  { %v2008_v21 = vsub.f32 %v1997_v61, %v2006_v20 }
0x16a6   :  { %v2010_v22 = vmul.f32 %v2008_v21, %v2008_v21 }
0x16a8   :  { %v2014_v23 = vsel %vm120_vm4, %v2010_v22, 0.0 }
0x16a9   :  { %2015 = vadd.xlane.f32.xlu1 %v2014_v23  ;;  %v1953_v26 = vpop.permute.xlu0 %1952 }
0x16aa   :  { %v1955_v27 = vmul.f32 %v1953_v26, %v3244_v28  ;;  %v2043_v28 = vld [vmem:[#allocation9] sm:$0xff] }
0x16ab   :  { %2594 = vmatpush3.msra.mxu0 %v2043_v28  ;;  %2605 = vmatpush3.msra.mxu1 %v2043_v28 }
0x16ac   :  { %v1956_v6 = vadd.f32 %v1955_v27, %v1948_v11  ;;  %2609 = vmatprep.subr.mxu0 %v2862_v0 }
0x16ba   :  { %2216 = vrot.lane.b32.xlu1 %v1956_v6, %s2866_s4 }
0x172a   :  { %v2013_v30 = vpop.xlane.xlu1 %2012 }
0x172b   :  { %v2017_v31 = vmul.f32 0.03125, %v2013_v30 }
0x172d   :  { %v2019_v32 = vadd.f32 1e-05, %v2017_v31 }
0x172f   :  { %2701 = vrsqrt.f32 %v2019_v32 }
0x1732   :  { %v2016_v33 = vpop.xlane.xlu1 %2015 }
0x1733   :  { %v2018_v35 = vmul.f32 0.03125, %v2016_v33 }
0x1735   :  { %v2020_v36 = vadd.f32 1e-05, %v2018_v35 }
0x1736   :  { %v2217_v16 = vpop.permute.xlu1 %2216 }
0x1737   :  { %2703 = vrsqrt.f32 %v2020_v36 }
0x173c   :  { %v2702_v37 = vpop.eup %2701 }
0x173d   :  { %v2023_v40 = vmul.f32 %v2702_v37, %v2007_v10 }
0x173f   :  { %v2032_v18 = vmul.f32 %v2357_v39, %v2023_v40 }
0x1741   :  { %v2041_v24 = vadd.f32 %v2358_v13, %v2032_v18 }
0x1743   :  { %2596 = vmatmul.mubr.msk.f32.vlgmr.msra.gmra.mxu0 %vm120_vm4, %v2041_v24 }
0x1744   :  { %v2704_v41 = vpop.eup %2703  ;;  %2610 = vmatpush3.msra.mxu0 %v2207_v25  ;;  %2617 = vmatprep.mubr.msk.f32.mxu0 %vm2863_vm0, %v2862_v0 }
0x1745   :  { %v2024_v34 = vmul.f32 %v2704_v41, %v2008_v21  ;;  %2611 = vmatprep.subr.mxu0 %v2862_v0 }
0x1746   :  { %2612 = vmatpush3.msra.mxu0 %v2206_v19 }
0x1747   :  { %2613 = vmatprep.subr.mxu0 %v2862_v0  ;;  %v2033_v51 = vmul.f32 %v2357_v39, %v2024_v34 }
0x1748   :  { %2614 = vmatpush3.msra.mxu0 %v2205_v42 }
0x1749   :  { %2615 = vmatprep.subr.mxu0 %v2862_v0  ;;  %v2042_v45 = vadd.f32 %v2358_v13, %v2033_v51  ;;  %v2362_v0 = vld [vmem:[%s3401_s10] ss:$0 sm:$0xff] }
0x174a   :  { %2616 = vmatpush3.msra.mxu0 %v2204_v44 }
0x174b   :  { %2618 = vmatmul.mubr.msk.f32.vlgmr.msra.gmra.mxu0 %vm120_vm4, %v2217_v16  ;;  %2607 = vmatmul.mubr.msk.f32.vlgmr.msra.gmra.mxu1 %vm120_vm4, %v2042_v45 }
0x1803   :  { %v2123_v38 = vpop.f32.mrf.mxu0 }
0x1804   :  { %v2124_v11 = vadd.f32 %v2359_v1, %v2123_v38 }
0x1805   :  { %v2597_v48 = vpop.f32.mrf.mxu0 }
0x1806   :  { %2128 = vst.msk [vmem:[#allocation12] sm:$0xff] %vm2127_vm13, %v2124_v11 }
0x180b   :  { %v2286_v49 = vpop.f32.mrf.mxu0  ;;  %v2198_v50 = vpop.f32.mrf.mxu1 }
0x180c   :  { %v2287_v53 = vadd.f32 %v2362_v0, %v2286_v49  ;;  %v2199_v2 = vadd.f32 %v2359_v1, %v2198_v50 }
0x180d   :  { %v2619_v52 = vpop.f32.mrf.mxu0  ;;  %v2608_v54 = vpop.f32.mrf.mxu1 }
0x180e   :  { %2203 = vst.msk [vmem:[#allocation12 + $0x8] sm:$0xff] %vm2127_vm13, %v2199_v2 }
0x180f   :  { %2291 = vst.msk [vmem:[#allocation13] sm:$0x3] %vm2290_vm14, %v2287_v53 }
0x1810   :  { %2816 = shalt.err (!%p2813_p1)
}
0x1811   :  { %2303 = dma.vmem_to_hbm [thread:$0]  %s2298_s19, 256, %s3402_s11, [#allocation5], %s2857_s26, %s2857_s26, %s2858_s27  }
0x1812   :  { %s2825_s22 = scalar_lea.vmem %s2311_s7, 32  ;;  %p2830_p3 = scmp.lt.s32.totalorder %s2311_s7, %s2311_s7 }
0x1813   :  { %p2826_p2 = scmp.ne.s32.totalorder %s2311_s7, %s2825_s22  ;;  %p2831_p4 = scmp.lt.s32.totalorder %s2825_s22, %s2825_s22 }
0x1815   :  { %p2832_p5 = por %p2831_p4, %p2830_p3 }
0x1817   :  { %p2833_p6 = pnand %p2832_p5, %p2826_p2 }
0x1819   :  { %2836 = shalt.err (!%p2833_p6)
}
0x181a   :  { %2313 = dma.vmem_to_hbm [thread:$0]  %s2311_s7, 32, %s3403_s12, [#allocation14]  }
0x181b   :  { %2851 = dma.done.wait [#allocation5], 256  }
0x181c   :  { %2852 = vsyncadd [#allocation5], 4294967040 }
0x181d   :  { %2853 = dma.done.wait [#allocation14], 32  }
0x181e   :  { %2854 = vsyncadd [#allocation14], 4294967264 }
0x181f   :  { %2320 = vsyncpa [#allocation4], 1 }
0x1820   :  { %2321 = vsyncpa [#allocation7], 1 }
0x1821   :  { %2322 = vsyncpa [#allocation10], 1 }
0x1822   :  { %2323 = vsyncpa [#allocation5], 1 }
0x1823   :  { %2324 = vsyncpa [#allocation14], 1 }

</bundles_post_ra>
